<compile_context>
chip_gen: v7x
topology: tpu7x:2x2x1
jax: 0.10.0
libtpu: 0.0.40
codegen_flags: <defaults>
</compile_context>

<pallas_src>
import functools

import jax
import jax.numpy as jnp
import numpy as np
from jax import lax
from jax.experimental import pallas as pl
from jax.experimental.pallas import tpu as pltpu


# ----------------------------------------------------------------------------
# Pallas kernel: whole dilated sequence resident in VMEM, time recurrence as an
# in-kernel loop.  Gate order (after wrapper permutation): i, f, o, g.
# ----------------------------------------------------------------------------
def _lstm_seq_kernel(gx_ref, whh_ref, out_ref, hN_ref, cN_ref, h_sc, c_sc):
    T = gx_ref.shape[0]
    Bd = gx_ref.shape[1]
    H = whh_ref.shape[0]

    h_sc[...] = jnp.zeros_like(h_sc)     # init_hidden -> zeros
    c_sc[...] = jnp.zeros_like(c_sc)

    # Hoisted (constant across time steps): lane mask selecting the sigmoid
    # lanes [0, 3H) (i, f, o) vs tanh lanes [3H, 4H) (g).
    lane = lax.broadcasted_iota(jnp.int32, (Bd, 4 * H), 1)
    sig_mask = lane < 3 * H

    def step(t):
        # (Bd, 4H) = full 128-lane width for H=32; only the recurrent matmul
        # remains in the serial loop (input projection + bias precomputed).
        gates = gx_ref[t] + jnp.dot(h_sc[...], whh_ref[...],
                                    preferred_element_type=jnp.float32)
        # Full-vreg nonlinearities selected with the hoisted lane mask.
        act = jnp.where(sig_mask, jax.nn.sigmoid(gates), jnp.tanh(gates))
        i_g = act[:, 0 * H:1 * H]
        f_g = act[:, 1 * H:2 * H]
        o_g = act[:, 2 * H:3 * H]
        g_g = act[:, 3 * H:4 * H]

        c_new = f_g * c_sc[...] + i_g * g_g
        h_new = o_g * jnp.tanh(c_new)

        c_sc[...] = c_new
        h_sc[...] = h_new
        # TODO(synk): for large T/H, pack 4 consecutive h_t into a (Bd, 128)
        # lane-dense slab before storing; at H=32/T<=8 this store is negligible.
        out_ref[t] = h_new

    if T <= 16:
        # Short, static trip count: unroll at trace time (static store offsets,
        # full scheduler visibility).
        for t in range(T):
            step(t)
    else:
        def body(t, carry):
            step(t)
            return carry
        lax.fori_loop(0, T, body, 0)

    # Final state written exactly once, after the recurrence.
    hN_ref[...] = h_sc[...]
    cN_ref[...] = c_sc[...]


def _reorder_gate_rows(w):
    """PyTorch LSTM gate-block order (i, f, g, o) -> (i, f, o, g) along axis 0."""
    i, f, g, o = jnp.split(w, 4, axis=0)
    return jnp.concatenate([i, f, o, g], axis=0)


def lstm_pallas(x, w_ih, w_hh, b_ih, b_hh):
    """Single-layer LSTM over a dilated sequence.

    x: (T, Bd, Din) f32.  Weights in PyTorch layout:
      w_ih (4H, Din), w_hh (4H, H), b_ih / b_hh (4H,).
    Returns (outputs (T, Bd, H), h_n (Bd, H), c_n (Bd, H)).
    """
    T, Bd, Din = x.shape
    H = w_hh.shape[1]

    # Permute gate blocks so sigmoid / tanh lanes are contiguous in the kernel.
    w_ih = _reorder_gate_rows(w_ih)
    w_hh = _reorder_gate_rows(w_hh)
    bias = _reorder_gate_rows(b_ih + b_hh)            # (4H,)

    wih_t = jnp.transpose(w_ih)                       # (Din, 4H)
    whh_t = jnp.transpose(w_hh)                       # (H, 4H)

    # Hoisted input projection for ALL time steps: one big batched matmul
    # (plain XLA, fused under the surrounding jit).  This is where bf16
    # weights + f32 accumulation would go on v6e/v7x.
    gx = jnp.einsum('tbd,dh->tbh', x, wih_t) + bias[None, None, :]   # (T, Bd, 4H)

    out_shapes = (
        jax.ShapeDtypeStruct((T, Bd, H), jnp.float32),
        jax.ShapeDtypeStruct((Bd, H), jnp.float32),
        jax.ShapeDtypeStruct((Bd, H), jnp.float32),
    )
    return pl.pallas_call(
        _lstm_seq_kernel,
        out_shape=out_shapes,
        grid_spec=pltpu.PrefetchScalarGridSpec(
            num_scalar_prefetch=0,
            grid=(1,),                                 # single invocation; loop in-kernel
            in_specs=[
                pl.BlockSpec((T, Bd, 4 * H), lambda i: (0, 0, 0)),
                pl.BlockSpec((H, 4 * H), lambda i: (0, 0)),
            ],
            out_specs=[
                pl.BlockSpec((T, Bd, H), lambda i: (0, 0, 0)),
                pl.BlockSpec((Bd, H), lambda i: (0, 0)),
                pl.BlockSpec((Bd, H), lambda i: (0, 0)),
            ],
            scratch_shapes=[
                pltpu.VMEM((Bd, H), jnp.float32),      # h carry
                pltpu.VMEM((Bd, H), jnp.float32),      # c carry
            ],
        ),
        compiler_params=pltpu.CompilerParams(
            dimension_semantics=("arbitrary",)),
    )(gx, whh_t)


# ----------------------------------------------------------------------------
# Pure-JAX reference LSTM (for a silent numeric cross-check).
# ----------------------------------------------------------------------------
def lstm_ref(x, w_ih, w_hh, b_ih, b_hh):
    H = w_hh.shape[1]
    Bd = x.shape[1]

    def step(carry, xt):
        h, c = carry
        gates = xt @ w_ih.T + h @ w_hh.T + b_ih + b_hh
        i = jax.nn.sigmoid(gates[:, 0 * H:1 * H])
        f = jax.nn.sigmoid(gates[:, 1 * H:2 * H])
        g = jnp.tanh(gates[:, 2 * H:3 * H])
        o = jax.nn.sigmoid(gates[:, 3 * H:4 * H])
        c = f * c + i * g
        h = o * jnp.tanh(c)
        return (h, c), h

    (h, c), ys = lax.scan(step, (jnp.zeros((Bd, H), jnp.float32),
                                 jnp.zeros((Bd, H), jnp.float32)), x)
    return ys, h, c


# ----------------------------------------------------------------------------
# DRNN glue (mirrors _pad_inputs / _prepare_inputs / _split_outputs / forward).
# ----------------------------------------------------------------------------
def drnn_layer(params, inputs, rate, lstm_fn):
    n_steps, B, F = inputs.shape
    dilated_steps = -(-n_steps // rate)
    pad = dilated_steps * rate - n_steps
    if pad:
        inputs = jnp.concatenate(
            [inputs, jnp.zeros((pad, B, F), inputs.dtype)], axis=0)
    # _prepare_inputs: interleave time-phases along the batch axis.
    # TODO(synk): fold this interleave / de-interleave into the kernel's
    # index_map (phase-aware GX layout) to avoid the extra activation copies.
    dilated_inputs = jnp.concatenate([inputs[j::rate] for j in range(rate)], axis=1)

    dilated_outputs, h_n, c_n = lstm_fn(dilated_inputs, *params)

    # _split_outputs
    blocks = [dilated_outputs[:, i * B:(i + 1) * B, :] for i in range(rate)]
    interleaved = jnp.stack(blocks).transpose(1, 0, 2, 3).reshape(
        dilated_outputs.shape[0] * rate, B, dilated_outputs.shape[2])
    outputs = interleaved[:n_steps]                 # _unpad_outputs
    hidden = (h_n[None], c_n[None])                 # (1, B*rate, H) each
    return outputs, hidden


def drnn_forward(params_per_layer, x, lstm_fn, batch_first=False):
    if batch_first:
        x = jnp.swapaxes(x, 0, 1)
    inputs = x
    layer_outputs = []
    for i, params in enumerate(params_per_layer):
        rate = 2 ** i
        inputs, _hidden = drnn_layer(params, inputs, rate, lstm_fn)
        layer_outputs.append(inputs[-rate:])
    if batch_first:
        inputs = jnp.swapaxes(inputs, 0, 1)
    return inputs, layer_outputs


# ----------------------------------------------------------------------------
# Deterministic parameter init (PyTorch LSTM default: U(-1/sqrt(H), 1/sqrt(H))).
# ----------------------------------------------------------------------------
def init_params(key, num_features, n_hidden, n_layers):
    params = []
    k = 1.0 / np.sqrt(n_hidden)
    for i in range(n_layers):
        din = num_features if i == 0 else n_hidden
        key, k1, k2, k3, k4 = jax.random.split(key, 5)
        w_ih = jax.random.uniform(k1, (4 * n_hidden, din), jnp.float32, -k, k)
        w_hh = jax.random.uniform(k2, (4 * n_hidden, n_hidden), jnp.float32, -k, k)
        b_ih = jax.random.uniform(k3, (4 * n_hidden,), jnp.float32, -k, k)
        b_hh = jax.random.uniform(k4, (4 * n_hidden,), jnp.float32, -k, k)
        params.append((w_ih, w_hh, b_ih, b_hh))
    return params


if __name__ == "__main__":
    # Small shapes: seq=8, batch=2, num_features=8, n_hidden=32, n_layers=3
    seq, batch, num_features, n_hidden, n_layers = 8, 2, 8, 32, 3
    key = jax.random.PRNGKey(0)
    key, xk = jax.random.split(key)
    x = jax.random.normal(xk, (seq, batch, num_features), jnp.float32)
    params = init_params(key, num_features, n_hidden, n_layers)

    # Single jit over the whole DRNN so the dilation glue, the hoisted
    # projections, and the Pallas recurrences all compile together.
    drnn_pallas = jax.jit(functools.partial(drnn_forward, lstm_fn=lstm_pallas))
    out, layer_outs = drnn_pallas(params, x)
    out = jax.block_until_ready(out)
    layer_outs = [jax.block_until_ready(o) for o in layer_outs]

    # Silent cross-check against a pure-JAX reference of the same DRNN.
    ref_out, ref_layer_outs = drnn_forward(params, x, lstm_ref)
    np.testing.assert_allclose(np.asarray(out), np.asarray(ref_out),
                               rtol=2e-3, atol=2e-3)
    for a, b in zip(layer_outs, ref_layer_outs):
        np.testing.assert_allclose(np.asarray(a), np.asarray(b),
                                   rtol=2e-3, atol=2e-3)

    print("KERNEL_OK")
</pallas_src>

<mosaic_0001>
module attributes {stable_mosaic.version = 11 : i64} {
  func.func @_lstm_seq_kernel(%arg0: i32, %arg1: memref<8x2x128xf32, #tpu.memory_space<vmem>>, %arg2: memref<32x128xf32, #tpu.memory_space<vmem>>, %arg3: memref<8x2x32xf32, #tpu.memory_space<vmem>>, %arg4: memref<2x32xf32, #tpu.memory_space<vmem>>, %arg5: memref<2x32xf32, #tpu.memory_space<vmem>>, %arg6: memref<2x32xf32, #tpu.memory_space<vmem>>, %arg7: memref<2x32xf32, #tpu.memory_space<vmem>>) attributes {dimension_semantics = [#tpu.dimension_semantics<arbitrary>], iteration_bounds = array<i64: 1>, scalar_prefetch = 0 : i64, scratch_operands = 2 : i64, tpu.core_type = #tpu.core_type<tc>, window_params = [{pipeline_mode = #tpu.pipeline_mode<synchronous>, transform_indices = @transform_0, window_bounds = array<i64: 8, 2, 128>}, {pipeline_mode = #tpu.pipeline_mode<synchronous>, transform_indices = @transform_1, window_bounds = array<i64: 32, 128>}, {pipeline_mode = #tpu.pipeline_mode<synchronous>, transform_indices = @transform_2, window_bounds = array<i64: 8, 2, 32>}, {pipeline_mode = #tpu.pipeline_mode<synchronous>, transform_indices = @transform_3, window_bounds = array<i64: 2, 32>}, {pipeline_mode = #tpu.pipeline_mode<synchronous>, transform_indices = @transform_4, window_bounds = array<i64: 2, 32>}]} {
    %cst = arith.constant 0.000000e+00 : f32
    %0 = vector.broadcast %cst : f32 to vector<2x32xf32>
    %c0 = arith.constant 0 : index
    %c0_0 = arith.constant 0 : index
    %1 = vector.load %arg6[%c0, %c0_0] : memref<2x32xf32, #tpu.memory_space<vmem>>, vector<2x32xf32>
    tpu.vector_store %arg6[%c0, %c0_0], %0 {strides = array<i32>} : memref<2x32xf32, #tpu.memory_space<vmem>>, vector<2x32xf32>,
    %cst_1 = arith.constant 0.000000e+00 : f32
    %2 = vector.broadcast %cst_1 : f32 to vector<2x32xf32>
    %c0_2 = arith.constant 0 : index
    %c0_3 = arith.constant 0 : index
    %3 = vector.load %arg7[%c0_2, %c0_3] : memref<2x32xf32, #tpu.memory_space<vmem>>, vector<2x32xf32>
    tpu.vector_store %arg7[%c0_2, %c0_3], %2 {strides = array<i32>} : memref<2x32xf32, #tpu.memory_space<vmem>>, vector<2x32xf32>,
    %4 = tpu.iota {dimensions = array<i32: 1>} : vector<2x128xi32>
    %c96_i32 = arith.constant 96 : i32
    %5 = vector.broadcast %c96_i32 : i32 to vector<2x128xi32>
    %6 = arith.cmpi slt, %4, %5 : vector<2x128xi32>
    %c0_4 = arith.constant 0 : index
    %c0_5 = arith.constant 0 : index
    %c0_6 = arith.constant 0 : index
    %7 = vector.load %arg1[%c0_4, %c0_5, %c0_6] : memref<8x2x128xf32, #tpu.memory_space<vmem>>, vector<1x2x128xf32>
    %8 = vector.shape_cast %7 : vector<1x2x128xf32> to vector<2x128xf32>
    %c0_7 = arith.constant 0 : index
    %c0_8 = arith.constant 0 : index
    %9 = vector.load %arg6[%c0_7, %c0_8] : memref<2x32xf32, #tpu.memory_space<vmem>>, vector<2x32xf32>
    %c0_9 = arith.constant 0 : index
    %c0_10 = arith.constant 0 : index
    %10 = vector.load %arg2[%c0_9, %c0_10] : memref<32x128xf32, #tpu.memory_space<vmem>>, vector<32x128xf32>
    %cst_11 = arith.constant dense<0.000000e+00> : vector<2x128xf32>
    %11 = tpu.matmul %9, %10, %cst_11 {dimension_numbers = #tpu.dot_dimension_numbers<[1], [0], [0], [1], [0, 0, 1, 1], [], []>} : vector<2x32xf32>, vector<32x128xf32>, vector<2x128xf32> -> vector<2x128xf32>
    %12 = arith.addf %8, %11 : vector<2x128xf32>
    %13 = arith.negf %12 : vector<2x128xf32>
    %14 = math.exp %13 : vector<2x128xf32>
    %cst_12 = arith.constant 1.000000e+00 : f32
    %15 = vector.broadcast %cst_12 : f32 to vector<2x128xf32>
    %16 = arith.addf %15, %14 : vector<2x128xf32>
    %17 = arith.divf %15, %16 : vector<2x128xf32>
    %18 = math.tanh %12 : vector<2x128xf32>
    %19 = arith.select %6, %17, %18 : vector<2x128xi1>, vector<2x128xf32>
    %20 = vector.extract_strided_slice %19 {offsets = [0, 0], sizes = [2, 32], strides = [1, 1]} : vector<2x128xf32> to vector<2x32xf32>
    %21 = vector.extract_strided_slice %19 {offsets = [0, 32], sizes = [2, 32], strides = [1, 1]} : vector<2x128xf32> to vector<2x32xf32>
    %22 = vector.extract_strided_slice %19 {offsets = [0, 64], sizes = [2, 32], strides = [1, 1]} : vector<2x128xf32> to vector<2x32xf32>
    %23 = vector.extract_strided_slice %19 {offsets = [0, 96], sizes = [2, 32], strides = [1, 1]} : vector<2x128xf32> to vector<2x32xf32>
    %c0_13 = arith.constant 0 : index
    %c0_14 = arith.constant 0 : index
    %24 = vector.load %arg7[%c0_13, %c0_14] : memref<2x32xf32, #tpu.memory_space<vmem>>, vector<2x32xf32>
    %25 = arith.mulf %21, %24 : vector<2x32xf32>
    %26 = arith.mulf %20, %23 : vector<2x32xf32>
    %27 = arith.addf %25, %26 : vector<2x32xf32>
    %28 = math.tanh %27 : vector<2x32xf32>
    %29 = arith.mulf %22, %28 : vector<2x32xf32>
    %c0_15 = arith.constant 0 : index
    %c0_16 = arith.constant 0 : index
    %30 = vector.load %arg7[%c0_15, %c0_16] : memref<2x32xf32, #tpu.memory_space<vmem>>, vector<2x32xf32>
    tpu.vector_store %arg7[%c0_15, %c0_16], %27 {strides = array<i32>} : memref<2x32xf32, #tpu.memory_space<vmem>>, vector<2x32xf32>,
    %c0_17 = arith.constant 0 : index
    %c0_18 = arith.constant 0 : index
    %31 = vector.load %arg6[%c0_17, %c0_18] : memref<2x32xf32, #tpu.memory_space<vmem>>, vector<2x32xf32>
    tpu.vector_store %arg6[%c0_17, %c0_18], %29 {strides = array<i32>} : memref<2x32xf32, #tpu.memory_space<vmem>>, vector<2x32xf32>,
    %c0_19 = arith.constant 0 : index
    %c0_20 = arith.constant 0 : index
    %c0_21 = arith.constant 0 : index
    %32 = vector.load %arg3[%c0_19, %c0_20, %c0_21] : memref<8x2x32xf32, #tpu.memory_space<vmem>>, vector<1x2x32xf32>
    %33 = vector.shape_cast %32 : vector<1x2x32xf32> to vector<2x32xf32>
    %34 = vector.shape_cast %29 : vector<2x32xf32> to vector<1x2x32xf32>
    tpu.vector_store %arg3[%c0_19, %c0_20, %c0_21], %34 {strides = array<i32>} : memref<8x2x32xf32, #tpu.memory_space<vmem>>, vector<1x2x32xf32>,
    %c1 = arith.constant 1 : index
    %c0_22 = arith.constant 0 : index
    %c0_23 = arith.constant 0 : index
    %35 = vector.load %arg1[%c1, %c0_22, %c0_23] : memref<8x2x128xf32, #tpu.memory_space<vmem>>, vector<1x2x128xf32>
    %36 = vector.shape_cast %35 : vector<1x2x128xf32> to vector<2x128xf32>
    %c0_24 = arith.constant 0 : index
    %c0_25 = arith.constant 0 : index
    %37 = vector.load %arg6[%c0_24, %c0_25] : memref<2x32xf32, #tpu.memory_space<vmem>>, vector<2x32xf32>
    %c0_26 = arith.constant 0 : index
    %c0_27 = arith.constant 0 : index
    %38 = vector.load %arg2[%c0_26, %c0_27] : memref<32x128xf32, #tpu.memory_space<vmem>>, vector<32x128xf32>
    %cst_28 = arith.constant dense<0.000000e+00> : vector<2x128xf32>
    %39 = tpu.matmul %37, %38, %cst_28 {dimension_numbers = #tpu.dot_dimension_numbers<[1], [0], [0], [1], [0, 0, 1, 1], [], []>} : vector<2x32xf32>, vector<32x128xf32>, vector<2x128xf32> -> vector<2x128xf32>
    %40 = arith.addf %36, %39 : vector<2x128xf32>
    %41 = arith.negf %40 : vector<2x128xf32>
    %42 = math.exp %41 : vector<2x128xf32>
    %cst_29 = arith.constant 1.000000e+00 : f32
    %43 = vector.broadcast %cst_29 : f32 to vector<2x128xf32>
    %44 = arith.addf %43, %42 : vector<2x128xf32>
    %45 = arith.divf %43, %44 : vector<2x128xf32>
    %46 = math.tanh %40 : vector<2x128xf32>
    %47 = arith.select %6, %45, %46 : vector<2x128xi1>, vector<2x128xf32>
    %48 = vector.extract_strided_slice %47 {offsets = [0, 0], sizes = [2, 32], strides = [1, 1]} : vector<2x128xf32> to vector<2x32xf32>
    %49 = vector.extract_strided_slice %47 {offsets = [0, 32], sizes = [2, 32], strides = [1, 1]} : vector<2x128xf32> to vector<2x32xf32>
    %50 = vector.extract_strided_slice %47 {offsets = [0, 64], sizes = [2, 32], strides = [1, 1]} : vector<2x128xf32> to vector<2x32xf32>
    %51 = vector.extract_strided_slice %47 {offsets = [0, 96], sizes = [2, 32], strides = [1, 1]} : vector<2x128xf32> to vector<2x32xf32>
    %c0_30 = arith.constant 0 : index
    %c0_31 = arith.constant 0 : index
    %52 = vector.load %arg7[%c0_30, %c0_31] : memref<2x32xf32, #tpu.memory_space<vmem>>, vector<2x32xf32>
    %53 = arith.mulf %49, %52 : vector<2x32xf32>
    %54 = arith.mulf %48, %51 : vector<2x32xf32>
    %55 = arith.addf %53, %54 : vector<2x32xf32>
    %56 = math.tanh %55 : vector<2x32xf32>
    %57 = arith.mulf %50, %56 : vector<2x32xf32>
    %c0_32 = arith.constant 0 : index
    %c0_33 = arith.constant 0 : index
    %58 = vector.load %arg7[%c0_32, %c0_33] : memref<2x32xf32, #tpu.memory_space<vmem>>, vector<2x32xf32>
    tpu.vector_store %arg7[%c0_32, %c0_33], %55 {strides = array<i32>} : memref<2x32xf32, #tpu.memory_space<vmem>>, vector<2x32xf32>,
    %c0_34 = arith.constant 0 : index
    %c0_35 = arith.constant 0 : index
    %59 = vector.load %arg6[%c0_34, %c0_35] : memref<2x32xf32, #tpu.memory_space<vmem>>, vector<2x32xf32>
    tpu.vector_store %arg6[%c0_34, %c0_35], %57 {strides = array<i32>} : memref<2x32xf32, #tpu.memory_space<vmem>>, vector<2x32xf32>,
    %c1_36 = arith.constant 1 : index
    %c0_37 = arith.constant 0 : index
    %c0_38 = arith.constant 0 : index
    %60 = vector.load %arg3[%c1_36, %c0_37, %c0_38] : memref<8x2x32xf32, #tpu.memory_space<vmem>>, vector<1x2x32xf32>
    %61 = vector.shape_cast %60 : vector<1x2x32xf32> to vector<2x32xf32>
    %62 = vector.shape_cast %57 : vector<2x32xf32> to vector<1x2x32xf32>
    tpu.vector_store %arg3[%c1_36, %c0_37, %c0_38], %62 {strides = array<i32>} : memref<8x2x32xf32, #tpu.memory_space<vmem>>, vector<1x2x32xf32>,
    %c2 = arith.constant 2 : index
    %c0_39 = arith.constant 0 : index
    %c0_40 = arith.constant 0 : index
    %63 = vector.load %arg1[%c2, %c0_39, %c0_40] : memref<8x2x128xf32, #tpu.memory_space<vmem>>, vector<1x2x128xf32>
    %64 = vector.shape_cast %63 : vector<1x2x128xf32> to vector<2x128xf32>
    %c0_41 = arith.constant 0 : index
    %c0_42 = arith.constant 0 : index
    %65 = vector.load %arg6[%c0_41, %c0_42] : memref<2x32xf32, #tpu.memory_space<vmem>>, vector<2x32xf32>
    %c0_43 = arith.constant 0 : index
    %c0_44 = arith.constant 0 : index
    %66 = vector.load %arg2[%c0_43, %c0_44] : memref<32x128xf32, #tpu.memory_space<vmem>>, vector<32x128xf32>
    %cst_45 = arith.constant dense<0.000000e+00> : vector<2x128xf32>
    %67 = tpu.matmul %65, %66, %cst_45 {dimension_numbers = #tpu.dot_dimension_numbers<[1], [0], [0], [1], [0, 0, 1, 1], [], []>} : vector<2x32xf32>, vector<32x128xf32>, vector<2x128xf32> -> vector<2x128xf32>
    %68 = arith.addf %64, %67 : vector<2x128xf32>
    %69 = arith.negf %68 : vector<2x128xf32>
    %70 = math.exp %69 : vector<2x128xf32>
    %cst_46 = arith.constant 1.000000e+00 : f32
    %71 = vector.broadcast %cst_46 : f32 to vector<2x128xf32>
    %72 = arith.addf %71, %70 : vector<2x128xf32>
    %73 = arith.divf %71, %72 : vector<2x128xf32>
    %74 = math.tanh %68 : vector<2x128xf32>
    %75 = arith.select %6, %73, %74 : vector<2x128xi1>, vector<2x128xf32>
    %76 = vector.extract_strided_slice %75 {offsets = [0, 0], sizes = [2, 32], strides = [1, 1]} : vector<2x128xf32> to vector<2x32xf32>
    %77 = vector.extract_strided_slice %75 {offsets = [0, 32], sizes = [2, 32], strides = [1, 1]} : vector<2x128xf32> to vector<2x32xf32>
    %78 = vector.extract_strided_slice %75 {offsets = [0, 64], sizes = [2, 32], strides = [1, 1]} : vector<2x128xf32> to vector<2x32xf32>
    %79 = vector.extract_strided_slice %75 {offsets = [0, 96], sizes = [2, 32], strides = [1, 1]} : vector<2x128xf32> to vector<2x32xf32>
    %c0_47 = arith.constant 0 : index
    %c0_48 = arith.constant 0 : index
    %80 = vector.load %arg7[%c0_47, %c0_48] : memref<2x32xf32, #tpu.memory_space<vmem>>, vector<2x32xf32>
    %81 = arith.mulf %77, %80 : vector<2x32xf32>
    %82 = arith.mulf %76, %79 : vector<2x32xf32>
    %83 = arith.addf %81, %82 : vector<2x32xf32>
    %84 = math.tanh %83 : vector<2x32xf32>
    %85 = arith.mulf %78, %84 : vector<2x32xf32>
    %c0_49 = arith.constant 0 : index
    %c0_50 = arith.constant 0 : index
    %86 = vector.load %arg7[%c0_49, %c0_50] : memref<2x32xf32, #tpu.memory_space<vmem>>, vector<2x32xf32>
    tpu.vector_store %arg7[%c0_49, %c0_50], %83 {strides = array<i32>} : memref<2x32xf32, #tpu.memory_space<vmem>>, vector<2x32xf32>,
    %c0_51 = arith.constant 0 : index
    %c0_52 = arith.constant 0 : index
    %87 = vector.load %arg6[%c0_51, %c0_52] : memref<2x32xf32, #tpu.memory_space<vmem>>, vector<2x32xf32>
    tpu.vector_store %arg6[%c0_51, %c0_52], %85 {strides = array<i32>} : memref<2x32xf32, #tpu.memory_space<vmem>>, vector<2x32xf32>,
    %c2_53 = arith.constant 2 : index
    %c0_54 = arith.constant 0 : index
    %c0_55 = arith.constant 0 : index
    %88 = vector.load %arg3[%c2_53, %c0_54, %c0_55] : memref<8x2x32xf32, #tpu.memory_space<vmem>>, vector<1x2x32xf32>
    %89 = vector.shape_cast %88 : vector<1x2x32xf32> to vector<2x32xf32>
    %90 = vector.shape_cast %85 : vector<2x32xf32> to vector<1x2x32xf32>
    tpu.vector_store %arg3[%c2_53, %c0_54, %c0_55], %90 {strides = array<i32>} : memref<8x2x32xf32, #tpu.memory_space<vmem>>, vector<1x2x32xf32>,
    %c3 = arith.constant 3 : index
    %c0_56 = arith.constant 0 : index
    %c0_57 = arith.constant 0 : index
    %91 = vector.load %arg1[%c3, %c0_56, %c0_57] : memref<8x2x128xf32, #tpu.memory_space<vmem>>, vector<1x2x128xf32>
    %92 = vector.shape_cast %91 : vector<1x2x128xf32> to vector<2x128xf32>
    %c0_58 = arith.constant 0 : index
    %c0_59 = arith.constant 0 : index
    %93 = vector.load %arg6[%c0_58, %c0_59] : memref<2x32xf32, #tpu.memory_space<vmem>>, vector<2x32xf32>
    %c0_60 = arith.constant 0 : index
    %c0_61 = arith.constant 0 : index
    %94 = vector.load %arg2[%c0_60, %c0_61] : memref<32x128xf32, #tpu.memory_space<vmem>>, vector<32x128xf32>
    %cst_62 = arith.constant dense<0.000000e+00> : vector<2x128xf32>
    %95 = tpu.matmul %93, %94, %cst_62 {dimension_numbers = #tpu.dot_dimension_numbers<[1], [0], [0], [1], [0, 0, 1, 1], [], []>} : vector<2x32xf32>, vector<32x128xf32>, vector<2x128xf32> -> vector<2x128xf32>
    %96 = arith.addf %92, %95 : vector<2x128xf32>
    %97 = arith.negf %96 : vector<2x128xf32>
    %98 = math.exp %97 : vector<2x128xf32>
    %cst_63 = arith.constant 1.000000e+00 : f32
    %99 = vector.broadcast %cst_63 : f32 to vector<2x128xf32>
    %100 = arith.addf %99, %98 : vector<2x128xf32>
    %101 = arith.divf %99, %100 : vector<2x128xf32>
    %102 = math.tanh %96 : vector<2x128xf32>
    %103 = arith.select %6, %101, %102 : vector<2x128xi1>, vector<2x128xf32>
    %104 = vector.extract_strided_slice %103 {offsets = [0, 0], sizes = [2, 32], strides = [1, 1]} : vector<2x128xf32> to vector<2x32xf32>
    %105 = vector.extract_strided_slice %103 {offsets = [0, 32], sizes = [2, 32], strides = [1, 1]} : vector<2x128xf32> to vector<2x32xf32>
    %106 = vector.extract_strided_slice %103 {offsets = [0, 64], sizes = [2, 32], strides = [1, 1]} : vector<2x128xf32> to vector<2x32xf32>
    %107 = vector.extract_strided_slice %103 {offsets = [0, 96], sizes = [2, 32], strides = [1, 1]} : vector<2x128xf32> to vector<2x32xf32>
    %c0_64 = arith.constant 0 : index
    %c0_65 = arith.constant 0 : index
    %108 = vector.load %arg7[%c0_64, %c0_65] : memref<2x32xf32, #tpu.memory_space<vmem>>, vector<2x32xf32>
    %109 = arith.mulf %105, %108 : vector<2x32xf32>
    %110 = arith.mulf %104, %107 : vector<2x32xf32>
    %111 = arith.addf %109, %110 : vector<2x32xf32>
    %112 = math.tanh %111 : vector<2x32xf32>
    %113 = arith.mulf %106, %112 : vector<2x32xf32>
    %c0_66 = arith.constant 0 : index
    %c0_67 = arith.constant 0 : index
    %114 = vector.load %arg7[%c0_66, %c0_67] : memref<2x32xf32, #tpu.memory_space<vmem>>, vector<2x32xf32>
    tpu.vector_store %arg7[%c0_66, %c0_67], %111 {strides = array<i32>} : memref<2x32xf32, #tpu.memory_space<vmem>>, vector<2x32xf32>,
    %c0_68 = arith.constant 0 : index
    %c0_69 = arith.constant 0 : index
    %115 = vector.load %arg6[%c0_68, %c0_69] : memref<2x32xf32, #tpu.memory_space<vmem>>, vector<2x32xf32>
    tpu.vector_store %arg6[%c0_68, %c0_69], %113 {strides = array<i32>} : memref<2x32xf32, #tpu.memory_space<vmem>>, vector<2x32xf32>,
    %c3_70 = arith.constant 3 : index
    %c0_71 = arith.constant 0 : index
    %c0_72 = arith.constant 0 : index
    %116 = vector.load %arg3[%c3_70, %c0_71, %c0_72] : memref<8x2x32xf32, #tpu.memory_space<vmem>>, vector<1x2x32xf32>
    %117 = vector.shape_cast %116 : vector<1x2x32xf32> to vector<2x32xf32>
    %118 = vector.shape_cast %113 : vector<2x32xf32> to vector<1x2x32xf32>
    tpu.vector_store %arg3[%c3_70, %c0_71, %c0_72], %118 {strides = array<i32>} : memref<8x2x32xf32, #tpu.memory_space<vmem>>, vector<1x2x32xf32>,
    %c4 = arith.constant 4 : index
    %c0_73 = arith.constant 0 : index
    %c0_74 = arith.constant 0 : index
    %119 = vector.load %arg1[%c4, %c0_73, %c0_74] : memref<8x2x128xf32, #tpu.memory_space<vmem>>, vector<1x2x128xf32>
    %120 = vector.shape_cast %119 : vector<1x2x128xf32> to vector<2x128xf32>
    %c0_75 = arith.constant 0 : index
    %c0_76 = arith.constant 0 : index
    %121 = vector.load %arg6[%c0_75, %c0_76] : memref<2x32xf32, #tpu.memory_space<vmem>>, vector<2x32xf32>
    %c0_77 = arith.constant 0 : index
    %c0_78 = arith.constant 0 : index
    %122 = vector.load %arg2[%c0_77, %c0_78] : memref<32x128xf32, #tpu.memory_space<vmem>>, vector<32x128xf32>
    %cst_79 = arith.constant dense<0.000000e+00> : vector<2x128xf32>
    %123 = tpu.matmul %121, %122, %cst_79 {dimension_numbers = #tpu.dot_dimension_numbers<[1], [0], [0], [1], [0, 0, 1, 1], [], []>} : vector<2x32xf32>, vector<32x128xf32>, vector<2x128xf32> -> vector<2x128xf32>
    %124 = arith.addf %120, %123 : vector<2x128xf32>
    %125 = arith.negf %124 : vector<2x128xf32>
    %126 = math.exp %125 : vector<2x128xf32>
    %cst_80 = arith.constant 1.000000e+00 : f32
    %127 = vector.broadcast %cst_80 : f32 to vector<2x128xf32>
    %128 = arith.addf %127, %126 : vector<2x128xf32>
    %129 = arith.divf %127, %128 : vector<2x128xf32>
    %130 = math.tanh %124 : vector<2x128xf32>
    %131 = arith.select %6, %129, %130 : vector<2x128xi1>, vector<2x128xf32>
    %132 = vector.extract_strided_slice %131 {offsets = [0, 0], sizes = [2, 32], strides = [1, 1]} : vector<2x128xf32> to vector<2x32xf32>
    %133 = vector.extract_strided_slice %131 {offsets = [0, 32], sizes = [2, 32], strides = [1, 1]} : vector<2x128xf32> to vector<2x32xf32>
    %134 = vector.extract_strided_slice %131 {offsets = [0, 64], sizes = [2, 32], strides = [1, 1]} : vector<2x128xf32> to vector<2x32xf32>
    %135 = vector.extract_strided_slice %131 {offsets = [0, 96], sizes = [2, 32], strides = [1, 1]} : vector<2x128xf32> to vector<2x32xf32>
    %c0_81 = arith.constant 0 : index
    %c0_82 = arith.constant 0 : index
    %136 = vector.load %arg7[%c0_81, %c0_82] : memref<2x32xf32, #tpu.memory_space<vmem>>, vector<2x32xf32>
    %137 = arith.mulf %133, %136 : vector<2x32xf32>
    %138 = arith.mulf %132, %135 : vector<2x32xf32>
    %139 = arith.addf %137, %138 : vector<2x32xf32>
    %140 = math.tanh %139 : vector<2x32xf32>
    %141 = arith.mulf %134, %140 : vector<2x32xf32>
    %c0_83 = arith.constant 0 : index
    %c0_84 = arith.constant 0 : index
    %142 = vector.load %arg7[%c0_83, %c0_84] : memref<2x32xf32, #tpu.memory_space<vmem>>, vector<2x32xf32>
    tpu.vector_store %arg7[%c0_83, %c0_84], %139 {strides = array<i32>} : memref<2x32xf32, #tpu.memory_space<vmem>>, vector<2x32xf32>,
    %c0_85 = arith.constant 0 : index
    %c0_86 = arith.constant 0 : index
    %143 = vector.load %arg6[%c0_85, %c0_86] : memref<2x32xf32, #tpu.memory_space<vmem>>, vector<2x32xf32>
    tpu.vector_store %arg6[%c0_85, %c0_86], %141 {strides = array<i32>} : memref<2x32xf32, #tpu.memory_space<vmem>>, vector<2x32xf32>,
    %c4_87 = arith.constant 4 : index
    %c0_88 = arith.constant 0 : index
    %c0_89 = arith.constant 0 : index
    %144 = vector.load %arg3[%c4_87, %c0_88, %c0_89] : memref<8x2x32xf32, #tpu.memory_space<vmem>>, vector<1x2x32xf32>
    %145 = vector.shape_cast %144 : vector<1x2x32xf32> to vector<2x32xf32>
    %146 = vector.shape_cast %141 : vector<2x32xf32> to vector<1x2x32xf32>
    tpu.vector_store %arg3[%c4_87, %c0_88, %c0_89], %146 {strides = array<i32>} : memref<8x2x32xf32, #tpu.memory_space<vmem>>, vector<1x2x32xf32>,
    %c5 = arith.constant 5 : index
    %c0_90 = arith.constant 0 : index
    %c0_91 = arith.constant 0 : index
    %147 = vector.load %arg1[%c5, %c0_90, %c0_91] : memref<8x2x128xf32, #tpu.memory_space<vmem>>, vector<1x2x128xf32>
    %148 = vector.shape_cast %147 : vector<1x2x128xf32> to vector<2x128xf32>
    %c0_92 = arith.constant 0 : index
    %c0_93 = arith.constant 0 : index
    %149 = vector.load %arg6[%c0_92, %c0_93] : memref<2x32xf32, #tpu.memory_space<vmem>>, vector<2x32xf32>
    %c0_94 = arith.constant 0 : index
    %c0_95 = arith.constant 0 : index
    %150 = vector.load %arg2[%c0_94, %c0_95] : memref<32x128xf32, #tpu.memory_space<vmem>>, vector<32x128xf32>
    %cst_96 = arith.constant dense<0.000000e+00> : vector<2x128xf32>
    %151 = tpu.matmul %149, %150, %cst_96 {dimension_numbers = #tpu.dot_dimension_numbers<[1], [0], [0], [1], [0, 0, 1, 1], [], []>} : vector<2x32xf32>, vector<32x128xf32>, vector<2x128xf32> -> vector<2x128xf32>
    %152 = arith.addf %148, %151 : vector<2x128xf32>
    %153 = arith.negf %152 : vector<2x128xf32>
    %154 = math.exp %153 : vector<2x128xf32>
    %cst_97 = arith.constant 1.000000e+00 : f32
    %155 = vector.broadcast %cst_97 : f32 to vector<2x128xf32>
    %156 = arith.addf %155, %154 : vector<2x128xf32>
    %157 = arith.divf %155, %156 : vector<2x128xf32>
    %158 = math.tanh %152 : vector<2x128xf32>
    %159 = arith.select %6, %157, %158 : vector<2x128xi1>, vector<2x128xf32>
    %160 = vector.extract_strided_slice %159 {offsets = [0, 0], sizes = [2, 32], strides = [1, 1]} : vector<2x128xf32> to vector<2x32xf32>
    %161 = vector.extract_strided_slice %159 {offsets = [0, 32], sizes = [2, 32], strides = [1, 1]} : vector<2x128xf32> to vector<2x32xf32>
    %162 = vector.extract_strided_slice %159 {offsets = [0, 64], sizes = [2, 32], strides = [1, 1]} : vector<2x128xf32> to vector<2x32xf32>
    %163 = vector.extract_strided_slice %159 {offsets = [0, 96], sizes = [2, 32], strides = [1, 1]} : vector<2x128xf32> to vector<2x32xf32>
    %c0_98 = arith.constant 0 : index
    %c0_99 = arith.constant 0 : index
    %164 = vector.load %arg7[%c0_98, %c0_99] : memref<2x32xf32, #tpu.memory_space<vmem>>, vector<2x32xf32>
    %165 = arith.mulf %161, %164 : vector<2x32xf32>
    %166 = arith.mulf %160, %163 : vector<2x32xf32>
    %167 = arith.addf %165, %166 : vector<2x32xf32>
    %168 = math.tanh %167 : vector<2x32xf32>
    %169 = arith.mulf %162, %168 : vector<2x32xf32>
    %c0_100 = arith.constant 0 : index
    %c0_101 = arith.constant 0 : index
    %170 = vector.load %arg7[%c0_100, %c0_101] : memref<2x32xf32, #tpu.memory_space<vmem>>, vector<2x32xf32>
    tpu.vector_store %arg7[%c0_100, %c0_101], %167 {strides = array<i32>} : memref<2x32xf32, #tpu.memory_space<vmem>>, vector<2x32xf32>,
    %c0_102 = arith.constant 0 : index
    %c0_103 = arith.constant 0 : index
    %171 = vector.load %arg6[%c0_102, %c0_103] : memref<2x32xf32, #tpu.memory_space<vmem>>, vector<2x32xf32>
    tpu.vector_store %arg6[%c0_102, %c0_103], %169 {strides = array<i32>} : memref<2x32xf32, #tpu.memory_space<vmem>>, vector<2x32xf32>,
    %c5_104 = arith.constant 5 : index
    %c0_105 = arith.constant 0 : index
    %c0_106 = arith.constant 0 : index
    %172 = vector.load %arg3[%c5_104, %c0_105, %c0_106] : memref<8x2x32xf32, #tpu.memory_space<vmem>>, vector<1x2x32xf32>
    %173 = vector.shape_cast %172 : vector<1x2x32xf32> to vector<2x32xf32>
    %174 = vector.shape_cast %169 : vector<2x32xf32> to vector<1x2x32xf32>
    tpu.vector_store %arg3[%c5_104, %c0_105, %c0_106], %174 {strides = array<i32>} : memref<8x2x32xf32, #tpu.memory_space<vmem>>, vector<1x2x32xf32>,
    %c6 = arith.constant 6 : index
    %c0_107 = arith.constant 0 : index
    %c0_108 = arith.constant 0 : index
    %175 = vector.load %arg1[%c6, %c0_107, %c0_108] : memref<8x2x128xf32, #tpu.memory_space<vmem>>, vector<1x2x128xf32>
    %176 = vector.shape_cast %175 : vector<1x2x128xf32> to vector<2x128xf32>
    %c0_109 = arith.constant 0 : index
    %c0_110 = arith.constant 0 : index
    %177 = vector.load %arg6[%c0_109, %c0_110] : memref<2x32xf32, #tpu.memory_space<vmem>>, vector<2x32xf32>
    %c0_111 = arith.constant 0 : index
    %c0_112 = arith.constant 0 : index
    %178 = vector.load %arg2[%c0_111, %c0_112] : memref<32x128xf32, #tpu.memory_space<vmem>>, vector<32x128xf32>
    %cst_113 = arith.constant dense<0.000000e+00> : vector<2x128xf32>
    %179 = tpu.matmul %177, %178, %cst_113 {dimension_numbers = #tpu.dot_dimension_numbers<[1], [0], [0], [1], [0, 0, 1, 1], [], []>} : vector<2x32xf32>, vector<32x128xf32>, vector<2x128xf32> -> vector<2x128xf32>
    %180 = arith.addf %176, %179 : vector<2x128xf32>
    %181 = arith.negf %180 : vector<2x128xf32>
    %182 = math.exp %181 : vector<2x128xf32>
    %cst_114 = arith.constant 1.000000e+00 : f32
    %183 = vector.broadcast %cst_114 : f32 to vector<2x128xf32>
    %184 = arith.addf %183, %182 : vector<2x128xf32>
    %185 = arith.divf %183, %184 : vector<2x128xf32>
    %186 = math.tanh %180 : vector<2x128xf32>
    %187 = arith.select %6, %185, %186 : vector<2x128xi1>, vector<2x128xf32>
    %188 = vector.extract_strided_slice %187 {offsets = [0, 0], sizes = [2, 32], strides = [1, 1]} : vector<2x128xf32> to vector<2x32xf32>
    %189 = vector.extract_strided_slice %187 {offsets = [0, 32], sizes = [2, 32], strides = [1, 1]} : vector<2x128xf32> to vector<2x32xf32>
    %190 = vector.extract_strided_slice %187 {offsets = [0, 64], sizes = [2, 32], strides = [1, 1]} : vector<2x128xf32> to vector<2x32xf32>
    %191 = vector.extract_strided_slice %187 {offsets = [0, 96], sizes = [2, 32], strides = [1, 1]} : vector<2x128xf32> to vector<2x32xf32>
    %c0_115 = arith.constant 0 : index
    %c0_116 = arith.constant 0 : index
    %192 = vector.load %arg7[%c0_115, %c0_116] : memref<2x32xf32, #tpu.memory_space<vmem>>, vector<2x32xf32>
    %193 = arith.mulf %189, %192 : vector<2x32xf32>
    %194 = arith.mulf %188, %191 : vector<2x32xf32>
    %195 = arith.addf %193, %194 : vector<2x32xf32>
    %196 = math.tanh %195 : vector<2x32xf32>
    %197 = arith.mulf %190, %196 : vector<2x32xf32>
    %c0_117 = arith.constant 0 : index
    %c0_118 = arith.constant 0 : index
    %198 = vector.load %arg7[%c0_117, %c0_118] : memref<2x32xf32, #tpu.memory_space<vmem>>, vector<2x32xf32>
    tpu.vector_store %arg7[%c0_117, %c0_118], %195 {strides = array<i32>} : memref<2x32xf32, #tpu.memory_space<vmem>>, vector<2x32xf32>,
    %c0_119 = arith.constant 0 : index
    %c0_120 = arith.constant 0 : index
    %199 = vector.load %arg6[%c0_119, %c0_120] : memref<2x32xf32, #tpu.memory_space<vmem>>, vector<2x32xf32>
    tpu.vector_store %arg6[%c0_119, %c0_120], %197 {strides = array<i32>} : memref<2x32xf32, #tpu.memory_space<vmem>>, vector<2x32xf32>,
    %c6_121 = arith.constant 6 : index
    %c0_122 = arith.constant 0 : index
    %c0_123 = arith.constant 0 : index
    %200 = vector.load %arg3[%c6_121, %c0_122, %c0_123] : memref<8x2x32xf32, #tpu.memory_space<vmem>>, vector<1x2x32xf32>
    %201 = vector.shape_cast %200 : vector<1x2x32xf32> to vector<2x32xf32>
    %202 = vector.shape_cast %197 : vector<2x32xf32> to vector<1x2x32xf32>
    tpu.vector_store %arg3[%c6_121, %c0_122, %c0_123], %202 {strides = array<i32>} : memref<8x2x32xf32, #tpu.memory_space<vmem>>, vector<1x2x32xf32>,
    %c7 = arith.constant 7 : index
    %c0_124 = arith.constant 0 : index
    %c0_125 = arith.constant 0 : index
    %203 = vector.load %arg1[%c7, %c0_124, %c0_125] : memref<8x2x128xf32, #tpu.memory_space<vmem>>, vector<1x2x128xf32>
    %204 = vector.shape_cast %203 : vector<1x2x128xf32> to vector<2x128xf32>
    %c0_126 = arith.constant 0 : index
    %c0_127 = arith.constant 0 : index
    %205 = vector.load %arg6[%c0_126, %c0_127] : memref<2x32xf32, #tpu.memory_space<vmem>>, vector<2x32xf32>
    %c0_128 = arith.constant 0 : index
    %c0_129 = arith.constant 0 : index
    %206 = vector.load %arg2[%c0_128, %c0_129] : memref<32x128xf32, #tpu.memory_space<vmem>>, vector<32x128xf32>
    %cst_130 = arith.constant dense<0.000000e+00> : vector<2x128xf32>
    %207 = tpu.matmul %205, %206, %cst_130 {dimension_numbers = #tpu.dot_dimension_numbers<[1], [0], [0], [1], [0, 0, 1, 1], [], []>} : vector<2x32xf32>, vector<32x128xf32>, vector<2x128xf32> -> vector<2x128xf32>
    %208 = arith.addf %204, %207 : vector<2x128xf32>
    %209 = arith.negf %208 : vector<2x128xf32>
    %210 = math.exp %209 : vector<2x128xf32>
    %cst_131 = arith.constant 1.000000e+00 : f32
    %211 = vector.broadcast %cst_131 : f32 to vector<2x128xf32>
    %212 = arith.addf %211, %210 : vector<2x128xf32>
    %213 = arith.divf %211, %212 : vector<2x128xf32>
    %214 = math.tanh %208 : vector<2x128xf32>
    %215 = arith.select %6, %213, %214 : vector<2x128xi1>, vector<2x128xf32>
    %216 = vector.extract_strided_slice %215 {offsets = [0, 0], sizes = [2, 32], strides = [1, 1]} : vector<2x128xf32> to vector<2x32xf32>
    %217 = vector.extract_strided_slice %215 {offsets = [0, 32], sizes = [2, 32], strides = [1, 1]} : vector<2x128xf32> to vector<2x32xf32>
    %218 = vector.extract_strided_slice %215 {offsets = [0, 64], sizes = [2, 32], strides = [1, 1]} : vector<2x128xf32> to vector<2x32xf32>
    %219 = vector.extract_strided_slice %215 {offsets = [0, 96], sizes = [2, 32], strides = [1, 1]} : vector<2x128xf32> to vector<2x32xf32>
    %c0_132 = arith.constant 0 : index
    %c0_133 = arith.constant 0 : index
    %220 = vector.load %arg7[%c0_132, %c0_133] : memref<2x32xf32, #tpu.memory_space<vmem>>, vector<2x32xf32>
    %221 = arith.mulf %217, %220 : vector<2x32xf32>
    %222 = arith.mulf %216, %219 : vector<2x32xf32>
    %223 = arith.addf %221, %222 : vector<2x32xf32>
    %224 = math.tanh %223 : vector<2x32xf32>
    %225 = arith.mulf %218, %224 : vector<2x32xf32>
    %c0_134 = arith.constant 0 : index
    %c0_135 = arith.constant 0 : index
    %226 = vector.load %arg7[%c0_134, %c0_135] : memref<2x32xf32, #tpu.memory_space<vmem>>, vector<2x32xf32>
    tpu.vector_store %arg7[%c0_134, %c0_135], %223 {strides = array<i32>} : memref<2x32xf32, #tpu.memory_space<vmem>>, vector<2x32xf32>,
    %c0_136 = arith.constant 0 : index
    %c0_137 = arith.constant 0 : index
    %227 = vector.load %arg6[%c0_136, %c0_137] : memref<2x32xf32, #tpu.memory_space<vmem>>, vector<2x32xf32>
    tpu.vector_store %arg6[%c0_136, %c0_137], %225 {strides = array<i32>} : memref<2x32xf32, #tpu.memory_space<vmem>>, vector<2x32xf32>,
    %c7_138 = arith.constant 7 : index
    %c0_139 = arith.constant 0 : index
    %c0_140 = arith.constant 0 : index
    %228 = vector.load %arg3[%c7_138, %c0_139, %c0_140] : memref<8x2x32xf32, #tpu.memory_space<vmem>>, vector<1x2x32xf32>
    %229 = vector.shape_cast %228 : vector<1x2x32xf32> to vector<2x32xf32>
    %230 = vector.shape_cast %225 : vector<2x32xf32> to vector<1x2x32xf32>
    tpu.vector_store %arg3[%c7_138, %c0_139, %c0_140], %230 {strides = array<i32>} : memref<8x2x32xf32, #tpu.memory_space<vmem>>, vector<1x2x32xf32>,
    %c0_141 = arith.constant 0 : index
    %c0_142 = arith.constant 0 : index
    %231 = vector.load %arg6[%c0_141, %c0_142] : memref<2x32xf32, #tpu.memory_space<vmem>>, vector<2x32xf32>
    %c0_143 = arith.constant 0 : index
    %c0_144 = arith.constant 0 : index
    %232 = vector.load %arg4[%c0_143, %c0_144] : memref<2x32xf32, #tpu.memory_space<vmem>>, vector<2x32xf32>
    tpu.vector_store %arg4[%c0_143, %c0_144], %231 {strides = array<i32>} : memref<2x32xf32, #tpu.memory_space<vmem>>, vector<2x32xf32>,
    %c0_145 = arith.constant 0 : index
    %c0_146 = arith.constant 0 : index
    %233 = vector.load %arg7[%c0_145, %c0_146] : memref<2x32xf32, #tpu.memory_space<vmem>>, vector<2x32xf32>
    %c0_147 = arith.constant 0 : index
    %c0_148 = arith.constant 0 : index
    %234 = vector.load %arg5[%c0_147, %c0_148] : memref<2x32xf32, #tpu.memory_space<vmem>>, vector<2x32xf32>
    tpu.vector_store %arg5[%c0_147, %c0_148], %233 {strides = array<i32>} : memref<2x32xf32, #tpu.memory_space<vmem>>, vector<2x32xf32>,
    return
  }
  func.func @transform_0(%arg0: i32) -> (i32, i32, i32) {
    %c0_i32 = arith.constant 0 : i32
    %c0_i32_0 = arith.constant 0 : i32
    %c0_i32_1 = arith.constant 0 : i32
    %c0_i32_2 = arith.constant 0 : i32
    return %c0_i32, %c0_i32_0, %c0_i32_1 : i32, i32, i32
  }
  func.func @transform_1(%arg0: i32) -> (i32, i32) {
    %c0_i32 = arith.constant 0 : i32
    %c0_i32_0 = arith.constant 0 : i32
    %c0_i32_1 = arith.constant 0 : i32
    return %c0_i32, %c0_i32_0 : i32, i32
  }
  func.func @transform_2(%arg0: i32) -> (i32, i32, i32) {
    %c0_i32 = arith.constant 0 : i32
    %c0_i32_0 = arith.constant 0 : i32
    %c0_i32_1 = arith.constant 0 : i32
    %c0_i32_2 = arith.constant 0 : i32
    return %c0_i32, %c0_i32_0, %c0_i32_1 : i32, i32, i32
  }
  func.func @transform_3(%arg0: i32) -> (i32, i32) {
    %c0_i32 = arith.constant 0 : i32
    %c0_i32_0 = arith.constant 0 : i32
    %c0_i32_1 = arith.constant 0 : i32
    return %c0_i32, %c0_i32_0 : i32, i32
  }
  func.func @transform_4(%arg0: i32) -> (i32, i32) {
    %c0_i32 = arith.constant 0 : i32
    %c0_i32_0 = arith.constant 0 : i32
    %c0_i32_1 = arith.constant 0 : i32
    return %c0_i32, %c0_i32_0 : i32, i32
  }
}

module attributes {stable_mosaic.version = 11 : i64} {
  func.func @_lstm_seq_kernel(%arg0: i32, %arg1: memref<4x4x128xf32, #tpu.memory_space<vmem>>, %arg2: memref<32x128xf32, #tpu.memory_space<vmem>>, %arg3: memref<4x4x32xf32, #tpu.memory_space<vmem>>, %arg4: memref<4x32xf32, #tpu.memory_space<vmem>>, %arg5: memref<4x32xf32, #tpu.memory_space<vmem>>, %arg6: memref<4x32xf32, #tpu.memory_space<vmem>>, %arg7: memref<4x32xf32, #tpu.memory_space<vmem>>) attributes {dimension_semantics = [#tpu.dimension_semantics<arbitrary>], iteration_bounds = array<i64: 1>, scalar_prefetch = 0 : i64, scratch_operands = 2 : i64, tpu.core_type = #tpu.core_type<tc>, window_params = [{pipeline_mode = #tpu.pipeline_mode<synchronous>, transform_indices = @transform_0, window_bounds = array<i64: 4, 4, 128>}, {pipeline_mode = #tpu.pipeline_mode<synchronous>, transform_indices = @transform_1, window_bounds = array<i64: 32, 128>}, {pipeline_mode = #tpu.pipeline_mode<synchronous>, transform_indices = @transform_2, window_bounds = array<i64: 4, 4, 32>}, {pipeline_mode = #tpu.pipeline_mode<synchronous>, transform_indices = @transform_3, window_bounds = array<i64: 4, 32>}, {pipeline_mode = #tpu.pipeline_mode<synchronous>, transform_indices = @transform_4, window_bounds = array<i64: 4, 32>}]} {
    %cst = arith.constant 0.000000e+00 : f32
    %0 = vector.broadcast %cst : f32 to vector<4x32xf32>
    %c0 = arith.constant 0 : index
    %c0_0 = arith.constant 0 : index
    %1 = vector.load %arg6[%c0, %c0_0] : memref<4x32xf32, #tpu.memory_space<vmem>>, vector<4x32xf32>
    tpu.vector_store %arg6[%c0, %c0_0], %0 {strides = array<i32>} : memref<4x32xf32, #tpu.memory_space<vmem>>, vector<4x32xf32>,
    %cst_1 = arith.constant 0.000000e+00 : f32
    %2 = vector.broadcast %cst_1 : f32 to vector<4x32xf32>
    %c0_2 = arith.constant 0 : index
    %c0_3 = arith.constant 0 : index
    %3 = vector.load %arg7[%c0_2, %c0_3] : memref<4x32xf32, #tpu.memory_space<vmem>>, vector<4x32xf32>
    tpu.vector_store %arg7[%c0_2, %c0_3], %2 {strides = array<i32>} : memref<4x32xf32, #tpu.memory_space<vmem>>, vector<4x32xf32>,
    %4 = tpu.iota {dimensions = array<i32: 1>} : vector<4x128xi32>
    %c96_i32 = arith.constant 96 : i32
    %5 = vector.broadcast %c96_i32 : i32 to vector<4x128xi32>
    %6 = arith.cmpi slt, %4, %5 : vector<4x128xi32>
    %c0_4 = arith.constant 0 : index
    %c0_5 = arith.constant 0 : index
    %c0_6 = arith.constant 0 : index
    %7 = vector.load %arg1[%c0_4, %c0_5, %c0_6] : memref<4x4x128xf32, #tpu.memory_space<vmem>>, vector<1x4x128xf32>
    %8 = vector.shape_cast %7 : vector<1x4x128xf32> to vector<4x128xf32>
    %c0_7 = arith.constant 0 : index
    %c0_8 = arith.constant 0 : index
    %9 = vector.load %arg6[%c0_7, %c0_8] : memref<4x32xf32, #tpu.memory_space<vmem>>, vector<4x32xf32>
    %c0_9 = arith.constant 0 : index
    %c0_10 = arith.constant 0 : index
    %10 = vector.load %arg2[%c0_9, %c0_10] : memref<32x128xf32, #tpu.memory_space<vmem>>, vector<32x128xf32>
    %cst_11 = arith.constant dense<0.000000e+00> : vector<4x128xf32>
    %11 = tpu.matmul %9, %10, %cst_11 {dimension_numbers = #tpu.dot_dimension_numbers<[1], [0], [0], [1], [0, 0, 1, 1], [], []>} : vector<4x32xf32>, vector<32x128xf32>, vector<4x128xf32> -> vector<4x128xf32>
    %12 = arith.addf %8, %11 : vector<4x128xf32>
    %13 = arith.negf %12 : vector<4x128xf32>
    %14 = math.exp %13 : vector<4x128xf32>
    %cst_12 = arith.constant 1.000000e+00 : f32
    %15 = vector.broadcast %cst_12 : f32 to vector<4x128xf32>
    %16 = arith.addf %15, %14 : vector<4x128xf32>
    %17 = arith.divf %15, %16 : vector<4x128xf32>
    %18 = math.tanh %12 : vector<4x128xf32>
    %19 = arith.select %6, %17, %18 : vector<4x128xi1>, vector<4x128xf32>
    %20 = vector.extract_strided_slice %19 {offsets = [0, 0], sizes = [4, 32], strides = [1, 1]} : vector<4x128xf32> to vector<4x32xf32>
    %21 = vector.extract_strided_slice %19 {offsets = [0, 32], sizes = [4, 32], strides = [1, 1]} : vector<4x128xf32> to vector<4x32xf32>
    %22 = vector.extract_strided_slice %19 {offsets = [0, 64], sizes = [4, 32], strides = [1, 1]} : vector<4x128xf32> to vector<4x32xf32>
    %23 = vector.extract_strided_slice %19 {offsets = [0, 96], sizes = [4, 32], strides = [1, 1]} : vector<4x128xf32> to vector<4x32xf32>
    %c0_13 = arith.constant 0 : index
    %c0_14 = arith.constant 0 : index
    %24 = vector.load %arg7[%c0_13, %c0_14] : memref<4x32xf32, #tpu.memory_space<vmem>>, vector<4x32xf32>
    %25 = arith.mulf %21, %24 : vector<4x32xf32>
    %26 = arith.mulf %20, %23 : vector<4x32xf32>
    %27 = arith.addf %25, %26 : vector<4x32xf32>
    %28 = math.tanh %27 : vector<4x32xf32>
    %29 = arith.mulf %22, %28 : vector<4x32xf32>
    %c0_15 = arith.constant 0 : index
    %c0_16 = arith.constant 0 : index
    %30 = vector.load %arg7[%c0_15, %c0_16] : memref<4x32xf32, #tpu.memory_space<vmem>>, vector<4x32xf32>
    tpu.vector_store %arg7[%c0_15, %c0_16], %27 {strides = array<i32>} : memref<4x32xf32, #tpu.memory_space<vmem>>, vector<4x32xf32>,
    %c0_17 = arith.constant 0 : index
    %c0_18 = arith.constant 0 : index
    %31 = vector.load %arg6[%c0_17, %c0_18] : memref<4x32xf32, #tpu.memory_space<vmem>>, vector<4x32xf32>
    tpu.vector_store %arg6[%c0_17, %c0_18], %29 {strides = array<i32>} : memref<4x32xf32, #tpu.memory_space<vmem>>, vector<4x32xf32>,
    %c0_19 = arith.constant 0 : index
    %c0_20 = arith.constant 0 : index
    %c0_21 = arith.constant 0 : index
    %32 = vector.load %arg3[%c0_19, %c0_20, %c0_21] : memref<4x4x32xf32, #tpu.memory_space<vmem>>, vector<1x4x32xf32>
    %33 = vector.shape_cast %32 : vector<1x4x32xf32> to vector<4x32xf32>
    %34 = vector.shape_cast %29 : vector<4x32xf32> to vector<1x4x32xf32>
    tpu.vector_store %arg3[%c0_19, %c0_20, %c0_21], %34 {strides = array<i32>} : memref<4x4x32xf32, #tpu.memory_space<vmem>>, vector<1x4x32xf32>,
    %c1 = arith.constant 1 : index
    %c0_22 = arith.constant 0 : index
    %c0_23 = arith.constant 0 : index
    %35 = vector.load %arg1[%c1, %c0_22, %c0_23] : memref<4x4x128xf32, #tpu.memory_space<vmem>>, vector<1x4x128xf32>
    %36 = vector.shape_cast %35 : vector<1x4x128xf32> to vector<4x128xf32>
    %c0_24 = arith.constant 0 : index
    %c0_25 = arith.constant 0 : index
    %37 = vector.load %arg6[%c0_24, %c0_25] : memref<4x32xf32, #tpu.memory_space<vmem>>, vector<4x32xf32>
    %c0_26 = arith.constant 0 : index
    %c0_27 = arith.constant 0 : index
    %38 = vector.load %arg2[%c0_26, %c0_27] : memref<32x128xf32, #tpu.memory_space<vmem>>, vector<32x128xf32>
    %cst_28 = arith.constant dense<0.000000e+00> : vector<4x128xf32>
    %39 = tpu.matmul %37, %38, %cst_28 {dimension_numbers = #tpu.dot_dimension_numbers<[1], [0], [0], [1], [0, 0, 1, 1], [], []>} : vector<4x32xf32>, vector<32x128xf32>, vector<4x128xf32> -> vector<4x128xf32>
    %40 = arith.addf %36, %39 : vector<4x128xf32>
    %41 = arith.negf %40 : vector<4x128xf32>
    %42 = math.exp %41 : vector<4x128xf32>
    %cst_29 = arith.constant 1.000000e+00 : f32
    %43 = vector.broadcast %cst_29 : f32 to vector<4x128xf32>
    %44 = arith.addf %43, %42 : vector<4x128xf32>
    %45 = arith.divf %43, %44 : vector<4x128xf32>
    %46 = math.tanh %40 : vector<4x128xf32>
    %47 = arith.select %6, %45, %46 : vector<4x128xi1>, vector<4x128xf32>
    %48 = vector.extract_strided_slice %47 {offsets = [0, 0], sizes = [4, 32], strides = [1, 1]} : vector<4x128xf32> to vector<4x32xf32>
    %49 = vector.extract_strided_slice %47 {offsets = [0, 32], sizes = [4, 32], strides = [1, 1]} : vector<4x128xf32> to vector<4x32xf32>
    %50 = vector.extract_strided_slice %47 {offsets = [0, 64], sizes = [4, 32], strides = [1, 1]} : vector<4x128xf32> to vector<4x32xf32>
    %51 = vector.extract_strided_slice %47 {offsets = [0, 96], sizes = [4, 32], strides = [1, 1]} : vector<4x128xf32> to vector<4x32xf32>
    %c0_30 = arith.constant 0 : index
    %c0_31 = arith.constant 0 : index
    %52 = vector.load %arg7[%c0_30, %c0_31] : memref<4x32xf32, #tpu.memory_space<vmem>>, vector<4x32xf32>
    %53 = arith.mulf %49, %52 : vector<4x32xf32>
    %54 = arith.mulf %48, %51 : vector<4x32xf32>
    %55 = arith.addf %53, %54 : vector<4x32xf32>
    %56 = math.tanh %55 : vector<4x32xf32>
    %57 = arith.mulf %50, %56 : vector<4x32xf32>
    %c0_32 = arith.constant 0 : index
    %c0_33 = arith.constant 0 : index
    %58 = vector.load %arg7[%c0_32, %c0_33] : memref<4x32xf32, #tpu.memory_space<vmem>>, vector<4x32xf32>
    tpu.vector_store %arg7[%c0_32, %c0_33], %55 {strides = array<i32>} : memref<4x32xf32, #tpu.memory_space<vmem>>, vector<4x32xf32>,
    %c0_34 = arith.constant 0 : index
    %c0_35 = arith.constant 0 : index
    %59 = vector.load %arg6[%c0_34, %c0_35] : memref<4x32xf32, #tpu.memory_space<vmem>>, vector<4x32xf32>
    tpu.vector_store %arg6[%c0_34, %c0_35], %57 {strides = array<i32>} : memref<4x32xf32, #tpu.memory_space<vmem>>, vector<4x32xf32>,
    %c1_36 = arith.constant 1 : index
    %c0_37 = arith.constant 0 : index
    %c0_38 = arith.constant 0 : index
    %60 = vector.load %arg3[%c1_36, %c0_37, %c0_38] : memref<4x4x32xf32, #tpu.memory_space<vmem>>, vector<1x4x32xf32>
    %61 = vector.shape_cast %60 : vector<1x4x32xf32> to vector<4x32xf32>
    %62 = vector.shape_cast %57 : vector<4x32xf32> to vector<1x4x32xf32>
    tpu.vector_store %arg3[%c1_36, %c0_37, %c0_38], %62 {strides = array<i32>} : memref<4x4x32xf32, #tpu.memory_space<vmem>>, vector<1x4x32xf32>,
    %c2 = arith.constant 2 : index
    %c0_39 = arith.constant 0 : index
    %c0_40 = arith.constant 0 : index
    %63 = vector.load %arg1[%c2, %c0_39, %c0_40] : memref<4x4x128xf32, #tpu.memory_space<vmem>>, vector<1x4x128xf32>
    %64 = vector.shape_cast %63 : vector<1x4x128xf32> to vector<4x128xf32>
    %c0_41 = arith.constant 0 : index
    %c0_42 = arith.constant 0 : index
    %65 = vector.load %arg6[%c0_41, %c0_42] : memref<4x32xf32, #tpu.memory_space<vmem>>, vector<4x32xf32>
    %c0_43 = arith.constant 0 : index
    %c0_44 = arith.constant 0 : index
    %66 = vector.load %arg2[%c0_43, %c0_44] : memref<32x128xf32, #tpu.memory_space<vmem>>, vector<32x128xf32>
    %cst_45 = arith.constant dense<0.000000e+00> : vector<4x128xf32>
    %67 = tpu.matmul %65, %66, %cst_45 {dimension_numbers = #tpu.dot_dimension_numbers<[1], [0], [0], [1], [0, 0, 1, 1], [], []>} : vector<4x32xf32>, vector<32x128xf32>, vector<4x128xf32> -> vector<4x128xf32>
    %68 = arith.addf %64, %67 : vector<4x128xf32>
    %69 = arith.negf %68 : vector<4x128xf32>
    %70 = math.exp %69 : vector<4x128xf32>
    %cst_46 = arith.constant 1.000000e+00 : f32
    %71 = vector.broadcast %cst_46 : f32 to vector<4x128xf32>
    %72 = arith.addf %71, %70 : vector<4x128xf32>
    %73 = arith.divf %71, %72 : vector<4x128xf32>
    %74 = math.tanh %68 : vector<4x128xf32>
    %75 = arith.select %6, %73, %74 : vector<4x128xi1>, vector<4x128xf32>
    %76 = vector.extract_strided_slice %75 {offsets = [0, 0], sizes = [4, 32], strides = [1, 1]} : vector<4x128xf32> to vector<4x32xf32>
    %77 = vector.extract_strided_slice %75 {offsets = [0, 32], sizes = [4, 32], strides = [1, 1]} : vector<4x128xf32> to vector<4x32xf32>
    %78 = vector.extract_strided_slice %75 {offsets = [0, 64], sizes = [4, 32], strides = [1, 1]} : vector<4x128xf32> to vector<4x32xf32>
    %79 = vector.extract_strided_slice %75 {offsets = [0, 96], sizes = [4, 32], strides = [1, 1]} : vector<4x128xf32> to vector<4x32xf32>
    %c0_47 = arith.constant 0 : index
    %c0_48 = arith.constant 0 : index
    %80 = vector.load %arg7[%c0_47, %c0_48] : memref<4x32xf32, #tpu.memory_space<vmem>>, vector<4x32xf32>
    %81 = arith.mulf %77, %80 : vector<4x32xf32>
    %82 = arith.mulf %76, %79 : vector<4x32xf32>
    %83 = arith.addf %81, %82 : vector<4x32xf32>
    %84 = math.tanh %83 : vector<4x32xf32>
    %85 = arith.mulf %78, %84 : vector<4x32xf32>
    %c0_49 = arith.constant 0 : index
    %c0_50 = arith.constant 0 : index
    %86 = vector.load %arg7[%c0_49, %c0_50] : memref<4x32xf32, #tpu.memory_space<vmem>>, vector<4x32xf32>
    tpu.vector_store %arg7[%c0_49, %c0_50], %83 {strides = array<i32>} : memref<4x32xf32, #tpu.memory_space<vmem>>, vector<4x32xf32>,
    %c0_51 = arith.constant 0 : index
    %c0_52 = arith.constant 0 : index
    %87 = vector.load %arg6[%c0_51, %c0_52] : memref<4x32xf32, #tpu.memory_space<vmem>>, vector<4x32xf32>
    tpu.vector_store %arg6[%c0_51, %c0_52], %85 {strides = array<i32>} : memref<4x32xf32, #tpu.memory_space<vmem>>, vector<4x32xf32>,
    %c2_53 = arith.constant 2 : index
    %c0_54 = arith.constant 0 : index
    %c0_55 = arith.constant 0 : index
    %88 = vector.load %arg3[%c2_53, %c0_54, %c0_55] : memref<4x4x32xf32, #tpu.memory_space<vmem>>, vector<1x4x32xf32>
    %89 = vector.shape_cast %88 : vector<1x4x32xf32> to vector<4x32xf32>
    %90 = vector.shape_cast %85 : vector<4x32xf32> to vector<1x4x32xf32>
    tpu.vector_store %arg3[%c2_53, %c0_54, %c0_55], %90 {strides = array<i32>} : memref<4x4x32xf32, #tpu.memory_space<vmem>>, vector<1x4x32xf32>,
    %c3 = arith.constant 3 : index
    %c0_56 = arith.constant 0 : index
    %c0_57 = arith.constant 0 : index
    %91 = vector.load %arg1[%c3, %c0_56, %c0_57] : memref<4x4x128xf32, #tpu.memory_space<vmem>>, vector<1x4x128xf32>
    %92 = vector.shape_cast %91 : vector<1x4x128xf32> to vector<4x128xf32>
    %c0_58 = arith.constant 0 : index
    %c0_59 = arith.constant 0 : index
    %93 = vector.load %arg6[%c0_58, %c0_59] : memref<4x32xf32, #tpu.memory_space<vmem>>, vector<4x32xf32>
    %c0_60 = arith.constant 0 : index
    %c0_61 = arith.constant 0 : index
    %94 = vector.load %arg2[%c0_60, %c0_61] : memref<32x128xf32, #tpu.memory_space<vmem>>, vector<32x128xf32>
    %cst_62 = arith.constant dense<0.000000e+00> : vector<4x128xf32>
    %95 = tpu.matmul %93, %94, %cst_62 {dimension_numbers = #tpu.dot_dimension_numbers<[1], [0], [0], [1], [0, 0, 1, 1], [], []>} : vector<4x32xf32>, vector<32x128xf32>, vector<4x128xf32> -> vector<4x128xf32>
    %96 = arith.addf %92, %95 : vector<4x128xf32>
    %97 = arith.negf %96 : vector<4x128xf32>
    %98 = math.exp %97 : vector<4x128xf32>
    %cst_63 = arith.constant 1.000000e+00 : f32
    %99 = vector.broadcast %cst_63 : f32 to vector<4x128xf32>
    %100 = arith.addf %99, %98 : vector<4x128xf32>
    %101 = arith.divf %99, %100 : vector<4x128xf32>
    %102 = math.tanh %96 : vector<4x128xf32>
    %103 = arith.select %6, %101, %102 : vector<4x128xi1>, vector<4x128xf32>
    %104 = vector.extract_strided_slice %103 {offsets = [0, 0], sizes = [4, 32], strides = [1, 1]} : vector<4x128xf32> to vector<4x32xf32>
    %105 = vector.extract_strided_slice %103 {offsets = [0, 32], sizes = [4, 32], strides = [1, 1]} : vector<4x128xf32> to vector<4x32xf32>
    %106 = vector.extract_strided_slice %103 {offsets = [0, 64], sizes = [4, 32], strides = [1, 1]} : vector<4x128xf32> to vector<4x32xf32>
    %107 = vector.extract_strided_slice %103 {offsets = [0, 96], sizes = [4, 32], strides = [1, 1]} : vector<4x128xf32> to vector<4x32xf32>
    %c0_64 = arith.constant 0 : index
    %c0_65 = arith.constant 0 : index
    %108 = vector.load %arg7[%c0_64, %c0_65] : memref<4x32xf32, #tpu.memory_space<vmem>>, vector<4x32xf32>
    %109 = arith.mulf %105, %108 : vector<4x32xf32>
    %110 = arith.mulf %104, %107 : vector<4x32xf32>
    %111 = arith.addf %109, %110 : vector<4x32xf32>
    %112 = math.tanh %111 : vector<4x32xf32>
    %113 = arith.mulf %106, %112 : vector<4x32xf32>
    %c0_66 = arith.constant 0 : index
    %c0_67 = arith.constant 0 : index
    %114 = vector.load %arg7[%c0_66, %c0_67] : memref<4x32xf32, #tpu.memory_space<vmem>>, vector<4x32xf32>
    tpu.vector_store %arg7[%c0_66, %c0_67], %111 {strides = array<i32>} : memref<4x32xf32, #tpu.memory_space<vmem>>, vector<4x32xf32>,
    %c0_68 = arith.constant 0 : index
    %c0_69 = arith.constant 0 : index
    %115 = vector.load %arg6[%c0_68, %c0_69] : memref<4x32xf32, #tpu.memory_space<vmem>>, vector<4x32xf32>
    tpu.vector_store %arg6[%c0_68, %c0_69], %113 {strides = array<i32>} : memref<4x32xf32, #tpu.memory_space<vmem>>, vector<4x32xf32>,
    %c3_70 = arith.constant 3 : index
    %c0_71 = arith.constant 0 : index
    %c0_72 = arith.constant 0 : index
    %116 = vector.load %arg3[%c3_70, %c0_71, %c0_72] : memref<4x4x32xf32, #tpu.memory_space<vmem>>, vector<1x4x32xf32>
    %117 = vector.shape_cast %116 : vector<1x4x32xf32> to vector<4x32xf32>
    %118 = vector.shape_cast %113 : vector<4x32xf32> to vector<1x4x32xf32>
    tpu.vector_store %arg3[%c3_70, %c0_71, %c0_72], %118 {strides = array<i32>} : memref<4x4x32xf32, #tpu.memory_space<vmem>>, vector<1x4x32xf32>,
    %c0_73 = arith.constant 0 : index
    %c0_74 = arith.constant 0 : index
    %119 = vector.load %arg6[%c0_73, %c0_74] : memref<4x32xf32, #tpu.memory_space<vmem>>, vector<4x32xf32>
    %c0_75 = arith.constant 0 : index
    %c0_76 = arith.constant 0 : index
    %120 = vector.load %arg4[%c0_75, %c0_76] : memref<4x32xf32, #tpu.memory_space<vmem>>, vector<4x32xf32>
    tpu.vector_store %arg4[%c0_75, %c0_76], %119 {strides = array<i32>} : memref<4x32xf32, #tpu.memory_space<vmem>>, vector<4x32xf32>,
    %c0_77 = arith.constant 0 : index
    %c0_78 = arith.constant 0 : index
    %121 = vector.load %arg7[%c0_77, %c0_78] : memref<4x32xf32, #tpu.memory_space<vmem>>, vector<4x32xf32>
    %c0_79 = arith.constant 0 : index
    %c0_80 = arith.constant 0 : index
    %122 = vector.load %arg5[%c0_79, %c0_80] : memref<4x32xf32, #tpu.memory_space<vmem>>, vector<4x32xf32>
    tpu.vector_store %arg5[%c0_79, %c0_80], %121 {strides = array<i32>} : memref<4x32xf32, #tpu.memory_space<vmem>>, vector<4x32xf32>,
    return
  }
  func.func @transform_0(%arg0: i32) -> (i32, i32, i32) {
    %c0_i32 = arith.constant 0 : i32
    %c0_i32_0 = arith.constant 0 : i32
    %c0_i32_1 = arith.constant 0 : i32
    %c0_i32_2 = arith.constant 0 : i32
    return %c0_i32, %c0_i32_0, %c0_i32_1 : i32, i32, i32
  }
  func.func @transform_1(%arg0: i32) -> (i32, i32) {
    %c0_i32 = arith.constant 0 : i32
    %c0_i32_0 = arith.constant 0 : i32
    %c0_i32_1 = arith.constant 0 : i32
    return %c0_i32, %c0_i32_0 : i32, i32
  }
  func.func @transform_2(%arg0: i32) -> (i32, i32, i32) {
    %c0_i32 = arith.constant 0 : i32
    %c0_i32_0 = arith.constant 0 : i32
    %c0_i32_1 = arith.constant 0 : i32
    %c0_i32_2 = arith.constant 0 : i32
    return %c0_i32, %c0_i32_0, %c0_i32_1 : i32, i32, i32
  }
  func.func @transform_3(%arg0: i32) -> (i32, i32) {
    %c0_i32 = arith.constant 0 : i32
    %c0_i32_0 = arith.constant 0 : i32
    %c0_i32_1 = arith.constant 0 : i32
    return %c0_i32, %c0_i32_0 : i32, i32
  }
  func.func @transform_4(%arg0: i32) -> (i32, i32) {
    %c0_i32 = arith.constant 0 : i32
    %c0_i32_0 = arith.constant 0 : i32
    %c0_i32_1 = arith.constant 0 : i32
    return %c0_i32, %c0_i32_0 : i32, i32
  }
}

module attributes {stable_mosaic.version = 11 : i64} {
  func.func @_lstm_seq_kernel(%arg0: i32, %arg1: memref<2x8x128xf32, #tpu.memory_space<vmem>>, %arg2: memref<32x128xf32, #tpu.memory_space<vmem>>, %arg3: memref<2x8x32xf32, #tpu.memory_space<vmem>>, %arg4: memref<8x32xf32, #tpu.memory_space<vmem>>, %arg5: memref<8x32xf32, #tpu.memory_space<vmem>>, %arg6: memref<8x32xf32, #tpu.memory_space<vmem>>, %arg7: memref<8x32xf32, #tpu.memory_space<vmem>>) attributes {dimension_semantics = [#tpu.dimension_semantics<arbitrary>], iteration_bounds = array<i64: 1>, scalar_prefetch = 0 : i64, scratch_operands = 2 : i64, tpu.core_type = #tpu.core_type<tc>, window_params = [{pipeline_mode = #tpu.pipeline_mode<synchronous>, transform_indices = @transform_0, window_bounds = array<i64: 2, 8, 128>}, {pipeline_mode = #tpu.pipeline_mode<synchronous>, transform_indices = @transform_1, window_bounds = array<i64: 32, 128>}, {pipeline_mode = #tpu.pipeline_mode<synchronous>, transform_indices = @transform_2, window_bounds = array<i64: 2, 8, 32>}, {pipeline_mode = #tpu.pipeline_mode<synchronous>, transform_indices = @transform_3, window_bounds = array<i64: 8, 32>}, {pipeline_mode = #tpu.pipeline_mode<synchronous>, transform_indices = @transform_4, window_bounds = array<i64: 8, 32>}]} {
    %cst = arith.constant 0.000000e+00 : f32
    %0 = vector.broadcast %cst : f32 to vector<8x32xf32>
    %c0 = arith.constant 0 : index
    %c0_0 = arith.constant 0 : index
    %1 = vector.load %arg6[%c0, %c0_0] : memref<8x32xf32, #tpu.memory_space<vmem>>, vector<8x32xf32>
    tpu.vector_store %arg6[%c0, %c0_0], %0 {strides = array<i32>} : memref<8x32xf32, #tpu.memory_space<vmem>>, vector<8x32xf32>,
    %cst_1 = arith.constant 0.000000e+00 : f32
    %2 = vector.broadcast %cst_1 : f32 to vector<8x32xf32>
    %c0_2 = arith.constant 0 : index
    %c0_3 = arith.constant 0 : index
    %3 = vector.load %arg7[%c0_2, %c0_3] : memref<8x32xf32, #tpu.memory_space<vmem>>, vector<8x32xf32>
    tpu.vector_store %arg7[%c0_2, %c0_3], %2 {strides = array<i32>} : memref<8x32xf32, #tpu.memory_space<vmem>>, vector<8x32xf32>,
    %4 = tpu.iota {dimensions = array<i32: 1>} : vector<8x128xi32>
    %c96_i32 = arith.constant 96 : i32
    %5 = vector.broadcast %c96_i32 : i32 to vector<8x128xi32>
    %6 = arith.cmpi slt, %4, %5 : vector<8x128xi32>
    %c0_4 = arith.constant 0 : index
    %c0_5 = arith.constant 0 : index
    %c0_6 = arith.constant 0 : index
    %7 = vector.load %arg1[%c0_4, %c0_5, %c0_6] : memref<2x8x128xf32, #tpu.memory_space<vmem>>, vector<1x8x128xf32>
    %8 = vector.shape_cast %7 : vector<1x8x128xf32> to vector<8x128xf32>
    %c0_7 = arith.constant 0 : index
    %c0_8 = arith.constant 0 : index
    %9 = vector.load %arg6[%c0_7, %c0_8] : memref<8x32xf32, #tpu.memory_space<vmem>>, vector<8x32xf32>
    %c0_9 = arith.constant 0 : index
    %c0_10 = arith.constant 0 : index
    %10 = vector.load %arg2[%c0_9, %c0_10] : memref<32x128xf32, #tpu.memory_space<vmem>>, vector<32x128xf32>
    %cst_11 = arith.constant dense<0.000000e+00> : vector<8x128xf32>
    %11 = tpu.matmul %9, %10, %cst_11 {dimension_numbers = #tpu.dot_dimension_numbers<[1], [0], [0], [1], [0, 0, 1, 1], [], []>} : vector<8x32xf32>, vector<32x128xf32>, vector<8x128xf32> -> vector<8x128xf32>
    %12 = arith.addf %8, %11 : vector<8x128xf32>
    %13 = arith.negf %12 : vector<8x128xf32>
    %14 = math.exp %13 : vector<8x128xf32>
    %cst_12 = arith.constant 1.000000e+00 : f32
    %15 = vector.broadcast %cst_12 : f32 to vector<8x128xf32>
    %16 = arith.addf %15, %14 : vector<8x128xf32>
    %17 = arith.divf %15, %16 : vector<8x128xf32>
    %18 = math.tanh %12 : vector<8x128xf32>
    %19 = arith.select %6, %17, %18 : vector<8x128xi1>, vector<8x128xf32>
    %20 = vector.extract_strided_slice %19 {offsets = [0, 0], sizes = [8, 32], strides = [1, 1]} : vector<8x128xf32> to vector<8x32xf32>
    %21 = vector.extract_strided_slice %19 {offsets = [0, 32], sizes = [8, 32], strides = [1, 1]} : vector<8x128xf32> to vector<8x32xf32>
    %22 = vector.extract_strided_slice %19 {offsets = [0, 64], sizes = [8, 32], strides = [1, 1]} : vector<8x128xf32> to vector<8x32xf32>
    %23 = vector.extract_strided_slice %19 {offsets = [0, 96], sizes = [8, 32], strides = [1, 1]} : vector<8x128xf32> to vector<8x32xf32>
    %c0_13 = arith.constant 0 : index
    %c0_14 = arith.constant 0 : index
    %24 = vector.load %arg7[%c0_13, %c0_14] : memref<8x32xf32, #tpu.memory_space<vmem>>, vector<8x32xf32>
    %25 = arith.mulf %21, %24 : vector<8x32xf32>
    %26 = arith.mulf %20, %23 : vector<8x32xf32>
    %27 = arith.addf %25, %26 : vector<8x32xf32>
    %28 = math.tanh %27 : vector<8x32xf32>
    %29 = arith.mulf %22, %28 : vector<8x32xf32>
    %c0_15 = arith.constant 0 : index
    %c0_16 = arith.constant 0 : index
    %30 = vector.load %arg7[%c0_15, %c0_16] : memref<8x32xf32, #tpu.memory_space<vmem>>, vector<8x32xf32>
    tpu.vector_store %arg7[%c0_15, %c0_16], %27 {strides = array<i32>} : memref<8x32xf32, #tpu.memory_space<vmem>>, vector<8x32xf32>,
    %c0_17 = arith.constant 0 : index
    %c0_18 = arith.constant 0 : index
    %31 = vector.load %arg6[%c0_17, %c0_18] : memref<8x32xf32, #tpu.memory_space<vmem>>, vector<8x32xf32>
    tpu.vector_store %arg6[%c0_17, %c0_18], %29 {strides = array<i32>} : memref<8x32xf32, #tpu.memory_space<vmem>>, vector<8x32xf32>,
    %c0_19 = arith.constant 0 : index
    %c0_20 = arith.constant 0 : index
    %c0_21 = arith.constant 0 : index
    %32 = vector.load %arg3[%c0_19, %c0_20, %c0_21] : memref<2x8x32xf32, #tpu.memory_space<vmem>>, vector<1x8x32xf32>
    %33 = vector.shape_cast %32 : vector<1x8x32xf32> to vector<8x32xf32>
    %34 = vector.shape_cast %29 : vector<8x32xf32> to vector<1x8x32xf32>
    tpu.vector_store %arg3[%c0_19, %c0_20, %c0_21], %34 {strides = array<i32>} : memref<2x8x32xf32, #tpu.memory_space<vmem>>, vector<1x8x32xf32>,
    %c1 = arith.constant 1 : index
    %c0_22 = arith.constant 0 : index
    %c0_23 = arith.constant 0 : index
    %35 = vector.load %arg1[%c1, %c0_22, %c0_23] : memref<2x8x128xf32, #tpu.memory_space<vmem>>, vector<1x8x128xf32>
    %36 = vector.shape_cast %35 : vector<1x8x128xf32> to vector<8x128xf32>
    %c0_24 = arith.constant 0 : index
    %c0_25 = arith.constant 0 : index
    %37 = vector.load %arg6[%c0_24, %c0_25] : memref<8x32xf32, #tpu.memory_space<vmem>>, vector<8x32xf32>
    %c0_26 = arith.constant 0 : index
    %c0_27 = arith.constant 0 : index
    %38 = vector.load %arg2[%c0_26, %c0_27] : memref<32x128xf32, #tpu.memory_space<vmem>>, vector<32x128xf32>
    %cst_28 = arith.constant dense<0.000000e+00> : vector<8x128xf32>
    %39 = tpu.matmul %37, %38, %cst_28 {dimension_numbers = #tpu.dot_dimension_numbers<[1], [0], [0], [1], [0, 0, 1, 1], [], []>} : vector<8x32xf32>, vector<32x128xf32>, vector<8x128xf32> -> vector<8x128xf32>
    %40 = arith.addf %36, %39 : vector<8x128xf32>
    %41 = arith.negf %40 : vector<8x128xf32>
    %42 = math.exp %41 : vector<8x128xf32>
    %cst_29 = arith.constant 1.000000e+00 : f32
    %43 = vector.broadcast %cst_29 : f32 to vector<8x128xf32>
    %44 = arith.addf %43, %42 : vector<8x128xf32>
    %45 = arith.divf %43, %44 : vector<8x128xf32>
    %46 = math.tanh %40 : vector<8x128xf32>
    %47 = arith.select %6, %45, %46 : vector<8x128xi1>, vector<8x128xf32>
    %48 = vector.extract_strided_slice %47 {offsets = [0, 0], sizes = [8, 32], strides = [1, 1]} : vector<8x128xf32> to vector<8x32xf32>
    %49 = vector.extract_strided_slice %47 {offsets = [0, 32], sizes = [8, 32], strides = [1, 1]} : vector<8x128xf32> to vector<8x32xf32>
    %50 = vector.extract_strided_slice %47 {offsets = [0, 64], sizes = [8, 32], strides = [1, 1]} : vector<8x128xf32> to vector<8x32xf32>
    %51 = vector.extract_strided_slice %47 {offsets = [0, 96], sizes = [8, 32], strides = [1, 1]} : vector<8x128xf32> to vector<8x32xf32>
    %c0_30 = arith.constant 0 : index
    %c0_31 = arith.constant 0 : index
    %52 = vector.load %arg7[%c0_30, %c0_31] : memref<8x32xf32, #tpu.memory_space<vmem>>, vector<8x32xf32>
    %53 = arith.mulf %49, %52 : vector<8x32xf32>
    %54 = arith.mulf %48, %51 : vector<8x32xf32>
    %55 = arith.addf %53, %54 : vector<8x32xf32>
    %56 = math.tanh %55 : vector<8x32xf32>
    %57 = arith.mulf %50, %56 : vector<8x32xf32>
    %c0_32 = arith.constant 0 : index
    %c0_33 = arith.constant 0 : index
    %58 = vector.load %arg7[%c0_32, %c0_33] : memref<8x32xf32, #tpu.memory_space<vmem>>, vector<8x32xf32>
    tpu.vector_store %arg7[%c0_32, %c0_33], %55 {strides = array<i32>} : memref<8x32xf32, #tpu.memory_space<vmem>>, vector<8x32xf32>,
    %c0_34 = arith.constant 0 : index
    %c0_35 = arith.constant 0 : index
    %59 = vector.load %arg6[%c0_34, %c0_35] : memref<8x32xf32, #tpu.memory_space<vmem>>, vector<8x32xf32>
    tpu.vector_store %arg6[%c0_34, %c0_35], %57 {strides = array<i32>} : memref<8x32xf32, #tpu.memory_space<vmem>>, vector<8x32xf32>,
    %c1_36 = arith.constant 1 : index
    %c0_37 = arith.constant 0 : index
    %c0_38 = arith.constant 0 : index
    %60 = vector.load %arg3[%c1_36, %c0_37, %c0_38] : memref<2x8x32xf32, #tpu.memory_space<vmem>>, vector<1x8x32xf32>
    %61 = vector.shape_cast %60 : vector<1x8x32xf32> to vector<8x32xf32>
    %62 = vector.shape_cast %57 : vector<8x32xf32> to vector<1x8x32xf32>
    tpu.vector_store %arg3[%c1_36, %c0_37, %c0_38], %62 {strides = array<i32>} : memref<2x8x32xf32, #tpu.memory_space<vmem>>, vector<1x8x32xf32>,
    %c0_39 = arith.constant 0 : index
    %c0_40 = arith.constant 0 : index
    %63 = vector.load %arg6[%c0_39, %c0_40] : memref<8x32xf32, #tpu.memory_space<vmem>>, vector<8x32xf32>
    %c0_41 = arith.constant 0 : index
    %c0_42 = arith.constant 0 : index
    %64 = vector.load %arg4[%c0_41, %c0_42] : memref<8x32xf32, #tpu.memory_space<vmem>>, vector<8x32xf32>
    tpu.vector_store %arg4[%c0_41, %c0_42], %63 {strides = array<i32>} : memref<8x32xf32, #tpu.memory_space<vmem>>, vector<8x32xf32>,
    %c0_43 = arith.constant 0 : index
    %c0_44 = arith.constant 0 : index
    %65 = vector.load %arg7[%c0_43, %c0_44] : memref<8x32xf32, #tpu.memory_space<vmem>>, vector<8x32xf32>
    %c0_45 = arith.constant 0 : index
    %c0_46 = arith.constant 0 : index
    %66 = vector.load %arg5[%c0_45, %c0_46] : memref<8x32xf32, #tpu.memory_space<vmem>>, vector<8x32xf32>
    tpu.vector_store %arg5[%c0_45, %c0_46], %65 {strides = array<i32>} : memref<8x32xf32, #tpu.memory_space<vmem>>, vector<8x32xf32>,
    return
  }
  func.func @transform_0(%arg0: i32) -> (i32, i32, i32) {
    %c0_i32 = arith.constant 0 : i32
    %c0_i32_0 = arith.constant 0 : i32
    %c0_i32_1 = arith.constant 0 : i32
    %c0_i32_2 = arith.constant 0 : i32
    return %c0_i32, %c0_i32_0, %c0_i32_1 : i32, i32, i32
  }
  func.func @transform_1(%arg0: i32) -> (i32, i32) {
    %c0_i32 = arith.constant 0 : i32
    %c0_i32_0 = arith.constant 0 : i32
    %c0_i32_1 = arith.constant 0 : i32
    return %c0_i32, %c0_i32_0 : i32, i32
  }
  func.func @transform_2(%arg0: i32) -> (i32, i32, i32) {
    %c0_i32 = arith.constant 0 : i32
    %c0_i32_0 = arith.constant 0 : i32
    %c0_i32_1 = arith.constant 0 : i32
    %c0_i32_2 = arith.constant 0 : i32
    return %c0_i32, %c0_i32_0, %c0_i32_1 : i32, i32, i32
  }
  func.func @transform_3(%arg0: i32) -> (i32, i32) {
    %c0_i32 = arith.constant 0 : i32
    %c0_i32_0 = arith.constant 0 : i32
    %c0_i32_1 = arith.constant 0 : i32
    return %c0_i32, %c0_i32_0 : i32, i32
  }
  func.func @transform_4(%arg0: i32) -> (i32, i32) {
    %c0_i32 = arith.constant 0 : i32
    %c0_i32_0 = arith.constant 0 : i32
    %c0_i32_1 = arith.constant 0 : i32
    return %c0_i32, %c0_i32_0 : i32, i32
  }
}

</mosaic_0001>

<bundles_post_ra>
// kernel: drnn_forward.4
= control target key start
LH: loop header
LB: loop body
LE: loop exit
PB: predicated region body
PF: predicated region fallthrough
CT: control target
= control target key end

     0   :  { %10 = vsyncpa [#allocation5], 0  ;;  %vm16_vm0 = vcmask 257024   ;;  %v739_v3 = vmov 0.0|0.0   ;;  %v740_v6 = vmov 0.0   ;;  %vm741_vm1 = vmmov 0   ;;  %s911_s0 = inlined_call_operand.vmem [shape: f32[4,4,128], index: 0, kind: input, shape index: {}]   ;;  %s912_s1 = inlined_call_operand.vmem [shape: f32[32,128], index: 1, kind: input, shape index: {}]   ;;  %s913_s2 = inlined_call_operand.vmem [shape: f32[4,4,32], index: 2, kind: output, shape index: {0}]   ;;  %s914_s3 = inlined_call_operand.hbm [shape: f32[4,32], index: 3, kind: output, shape index: {1}]   ;;  %s915_s4 = inlined_call_operand.hbm [shape: f32[4,32], index: 4, kind: output, shape index: {2}]  }
   0x1   :  { %v24_v0 = vld [vmem:[%s912_s1] sm:$0xff]  ;;  %v25_v1 = vld [vmem:[%s912_s1 + $0x8] sm:$0xff]  ;;  %v26_v2 = vld [vmem:[%s912_s1 + $0x10] sm:$0xff]  ;;  %627 = vmatprep.subr.bf16.mxu0 %v739_v3  ;;  %17 = vst.msk [vmem:[#allocation2] sm:$0xf] %vm16_vm0, %v740_v6  ;;  %633 = vmatprep.subr.bf16.mxu1 %v739_v3 }
   0x2   :  { %v782_v4 = vpack.c.bf16 %v25_v1, %v24_v0  ;;  %v27_v5 = vld [vmem:[%s912_s1 + $0x18] sm:$0xff]  ;;  %18 = vst.msk [vmem:[#allocation3] sm:$0xf] %vm16_vm0, %v740_v6  ;;  %591 = vmatprep.mubr.msk.f32.mxu0 %vm741_vm1, %v740_v6  ;;  %602 = vmatprep.mubr.msk.f32.mxu1 %vm741_vm1, %v740_v6 }
   0x3   :  { %11 = vsyncpa [#allocation7], 0  ;;  %v631_v7 = vpack.c.bf16 %v27_v5, %v26_v2  ;;  %vm28_vm2 = vcmask 261120   ;;  %v22_v9 = vld [vmem:[%s911_s0] sm:$0xf]  ;;  %v19_v16 = vlaneseq  ;;  %s742_s24 = smov 32  }
   0x4   :  { %629 = vmatpush3.bf16.msra.mxu0 %v782_v4  ;;  %635 = vmatpush3.bf16.msra.mxu1 %v782_v4  ;;  %s743_s25 = smov 96   ;;  %s744_s26 = smov 64   ;;  %v551_v35 = vld [vmem:[%s911_s0 + $0x4] sm:$0xf]  ;;  %v555_v58 = vld [vmem:[%s911_s0 + $0x8] sm:$0xf] }
   0x5   :  { %630 = vmatprep.subr.bf16.mxu0 %v739_v3  ;;  %636 = vmatprep.subr.bf16.mxu1 %v739_v3  ;;  %v810_v17 = vand.u32 127, %v19_v16 }
   0x7   :  { %vm21_vm3 = vcmp.lt.s32.totalorder %v810_v17, 96 }
   0x8   :  { %632 = vmatpush3.bf16.msra.mxu0 %v631_v7  ;;  %638 = vmatpush3.bf16.msra.mxu1 %v631_v7  ;;  %v23_v8 = vld [vmem:[#allocation2] sm:$0xf] }
   0x9   :  { %639 = vmatprep.subr.bf16.mxu0 %v739_v3  ;;  %645 = vmatprep.subr.bf16.mxu1 %v739_v3  ;;  %v111_v21 = vld [vmem:[#allocation3] sm:$0xf] }
   0xb   :  { %592 = vmatmul.mubr.msk.f32.vlgmr.msra.gmra.mrb[0].mxu0 %vm28_vm2, %v23_v8 }
   0xc   :  { %641 = vmatpush3.bf16.msra.mxu0 %v782_v4  ;;  %613 = vmatprep.mubr.msk.f32.mxu0 %vm741_vm1, %v740_v6 }
   0xd   :  { %642 = vmatprep.subr.bf16.mxu0 %v739_v3 }
  0x10   :  { %644 = vmatpush3.bf16.msra.mxu0 %v631_v7 }
  0xde   :  { %v98_v10 = vpop.f32.mrb[0].mxu0 }
  0xdf   :  { %v102_v11 = vadd.f32 %v98_v10, %v22_v9  ;;  %v593_v12 = vpop.f32.mrb[1].mxu0 }
  0xe1   :  { %v550_v13 = vmul.f32 -1.442695, %v102_v11 }
  0xe3   :  { %659 = vpow2.f32 %v550_v13 }
  0xe4   :  { %661 = vtanh.f32 %v102_v11 }
  0xed   :  { %v660_v14 = vpop.eup %659 }
  0xee   :  { %v106_v15 = vadd.f32 1.0, %v660_v14  ;;  %v662_v18 = vpop.eup %661 }
  0xf0   :  { %663 = vrcp.f32 %v106_v15 }
  0xfa   :  { %v664_v19 = vpop.eup %663 }
  0xfb   :  { %v110_v20 = vsel %vm21_vm3, %v664_v19, %v662_v18  ;;  %v559_v18 = vld [vmem:[%s911_s0 + $0xc] sm:$0xf]  ;;  %s745_s0 = smov [#allocation6]  }
  0xfc   :  { %118 = vrot.lane.b32.xlu0 %v110_v20, %s742_s24  ;;  %s535_s13 = sshll.u32 %s745_s0, 4  ;;  %s536_s13 = int_to_ptr.vmem [resolvable:$true] %s535_s13 }
  0xfd   :  { %s691_s14 = scalar_lea.vmem %s536_s13, 64  ;;  %p696_p1 = scmp.lt.s32.totalorder %s536_s13, %s536_s13 }
  0xfe   :  { %p692_p0 = scmp.ne.s32.totalorder %s536_s13, %s691_s14  ;;  %p697_p2 = scmp.lt.s32.totalorder %s691_s14, %s691_s14 }
 0x100   :  { %113 = vrot.lane.b32.xlu0 %v111_v21, %s742_s24  ;;  %p698_p3 = por %p697_p2, %p696_p1 }
 0x102   :  { %p699_p4 = pnand %p698_p3, %p692_p0 }
 0x16e   :  { %v119_v22 = vpop.permute.xlu0 %118 }
 0x16f   :  { %v121_v23 = vmul.f32 %v119_v22, %v110_v20 }
 0x171   :  { %123 = vrot.lane.b32.xlu1 %v121_v23, %s742_s24 }
 0x172   :  { %v114_v24 = vpop.permute.xlu0 %113 }
 0x173   :  { %v116_v25 = vmul.f32 %v114_v24, %v110_v20 }
 0x1e3   :  { %v124_v26 = vpop.permute.xlu1 %123 }
 0x1e4   :  { %v126_v27 = vadd.f32 %v124_v26, %v116_v25 }
 0x1e6   :  { %665 = vtanh.f32 %v126_v27 }
 0x1f0   :  { %v666_v28 = vpop.eup %665 }
 0x1f1   :  { %129 = vrot.lane.b32.xlu1 %v666_v28, %s742_s24 }
 0x1f5   :  { %134 = vrot.lane.b32.xlu1 %v126_v27, %s743_s25 }
 0x263   :  { %v130_v29 = vpop.permute.xlu1 %129 }
 0x264   :  { %v132_v30 = vmul.f32 %v130_v29, %v110_v20 }
 0x266   :  { %139 = vrot.lane.b32.xlu0 %v132_v30, %s744_s26 }
 0x267   :  { %v135_v31 = vpop.permute.xlu1 %134 }
 0x268   :  { %137 = vst.msk [vmem:[#allocation3] sm:$0xf] %vm16_vm0, %v135_v31 }
 0x26f   :  { %v233_v32 = vld [vmem:[#allocation3] sm:$0xf] }
 0x270   :  { %235 = vrot.lane.b32.xlu1 %v233_v32, %s742_s24 }
 0x2d8   :  { %v140_v33 = vpop.permute.xlu0 %139 }
 0x2d9   :  { %142 = vst.msk [vmem:[#allocation2] sm:$0xf] %vm16_vm0, %v140_v33  ;;  %143 = vst.msk [vmem:[%s913_s2] sm:$0xf] %vm16_vm0, %v140_v33 }
 0x2e0   :  { %v146_v34 = vld [vmem:[#allocation2] sm:$0xf] }
 0x2e1   :  { %603 = vmatmul.mubr.msk.f32.vlgmr.msra.gmra.mrb[0].mxu1 %vm28_vm2, %v146_v34 }
 0x2e2   :  { %647 = vmatpush3.bf16.msra.mxu1 %v782_v4  ;;  %624 = vmatprep.mubr.msk.f32.mxu1 %vm741_vm1, %v740_v6  ;;  %v236_v47 = vpop.permute.xlu1 %235 }
 0x2e3   :  { %648 = vmatprep.subr.bf16.mxu1 %v739_v3 }
 0x2e6   :  { %650 = vmatpush3.bf16.msra.mxu1 %v631_v7 }
 0x3b4   :  { %v220_v36 = vpop.f32.mrb[0].mxu1 }
 0x3b5   :  { %v224_v37 = vadd.f32 %v551_v35, %v220_v36  ;;  %v604_v38 = vpop.f32.mrb[1].mxu1 }
 0x3b7   :  { %v553_v39 = vmul.f32 -1.442695, %v224_v37 }
 0x3b9   :  { %667 = vpow2.f32 %v553_v39 }
 0x3ba   :  { %669 = vtanh.f32 %v224_v37 }
 0x3c3   :  { %v668_v40 = vpop.eup %667 }
 0x3c4   :  { %v228_v41 = vadd.f32 1.0, %v668_v40  ;;  %v670_v42 = vpop.eup %669 }
 0x3c6   :  { %671 = vrcp.f32 %v228_v41 }
 0x3d0   :  { %v672_v43 = vpop.eup %671 }
 0x3d1   :  { %v232_v44 = vsel %vm21_vm3, %v672_v43, %v670_v42 }
 0x3d2   :  { %240 = vrot.lane.b32.xlu0 %v232_v44, %s742_s24  ;;  %v238_v48 = vmul.f32 %v236_v47, %v232_v44 }
 0x444   :  { %v241_v45 = vpop.permute.xlu0 %240 }
 0x445   :  { %v243_v46 = vmul.f32 %v241_v45, %v232_v44 }
 0x447   :  { %245 = vrot.lane.b32.xlu0 %v243_v46, %s742_s24 }
 0x4b9   :  { %v246_v49 = vpop.permute.xlu0 %245 }
 0x4ba   :  { %v248_v50 = vadd.f32 %v246_v49, %v238_v48 }
 0x4bc   :  { %673 = vtanh.f32 %v248_v50 }
 0x4c6   :  { %v674_v51 = vpop.eup %673 }
 0x4c7   :  { %251 = vrot.lane.b32.xlu1 %v674_v51, %s742_s24 }
 0x4cb   :  { %256 = vrot.lane.b32.xlu1 %v248_v50, %s743_s25 }
 0x539   :  { %v252_v52 = vpop.permute.xlu1 %251 }
 0x53a   :  { %v254_v53 = vmul.f32 %v252_v52, %v232_v44 }
 0x53c   :  { %261 = vrot.lane.b32.xlu0 %v254_v53, %s744_s26 }
 0x53d   :  { %v257_v54 = vpop.permute.xlu1 %256 }
 0x53e   :  { %259 = vst.msk [vmem:[#allocation3] sm:$0xf] %vm16_vm0, %v257_v54 }
 0x545   :  { %v356_v55 = vld [vmem:[#allocation3] sm:$0xf] }
 0x546   :  { %358 = vrot.lane.b32.xlu1 %v356_v55, %s742_s24 }
 0x5ae   :  { %v262_v56 = vpop.permute.xlu0 %261 }
 0x5af   :  { %264 = vst.msk [vmem:[#allocation2] sm:$0xf] %vm16_vm0, %v262_v56  ;;  %554 = vst.msk [vmem:[%s913_s2 + $0x4] sm:$0xf] %vm16_vm0, %v262_v56 }
 0x5b6   :  { %v269_v57 = vld [vmem:[#allocation2] sm:$0xf] }
 0x5b7   :  { %614 = vmatmul.mubr.msk.f32.vlgmr.msra.gmra.mrb[2].mxu0 %vm28_vm2, %v269_v57 }
 0x5b8   :  { %v359_v6 = vpop.permute.xlu1 %358 }
 0x68a   :  { %v343_v59 = vpop.f32.mrb[2].mxu0 }
 0x68b   :  { %v347_v60 = vadd.f32 %v555_v58, %v343_v59  ;;  %v615_v61 = vpop.f32.mrb[3].mxu0 }
 0x68d   :  { %v557_v62 = vmul.f32 -1.442695, %v347_v60 }
 0x68f   :  { %675 = vpow2.f32 %v557_v62 }
 0x690   :  { %677 = vtanh.f32 %v347_v60 }
 0x699   :  { %v676_v63 = vpop.eup %675 }
 0x69a   :  { %v351_v0 = vadd.f32 1.0, %v676_v63  ;;  %v678_v1 = vpop.eup %677 }
 0x69c   :  { %679 = vrcp.f32 %v351_v0 }
 0x6a6   :  { %v680_v2 = vpop.eup %679 }
 0x6a7   :  { %v355_v3 = vsel %vm21_vm3, %v680_v2, %v678_v1 }
 0x6a8   :  { %363 = vrot.lane.b32.xlu0 %v355_v3, %s742_s24  ;;  %v361_v7 = vmul.f32 %v359_v6, %v355_v3 }
 0x71a   :  { %v364_v4 = vpop.permute.xlu0 %363 }
 0x71b   :  { %v366_v5 = vmul.f32 %v364_v4, %v355_v3 }
 0x71d   :  { %368 = vrot.lane.b32.xlu0 %v366_v5, %s742_s24 }
 0x78f   :  { %v369_v8 = vpop.permute.xlu0 %368 }
 0x790   :  { %v371_v9 = vadd.f32 %v369_v8, %v361_v7 }
 0x792   :  { %681 = vtanh.f32 %v371_v9 }
 0x79c   :  { %v682_v10 = vpop.eup %681 }
 0x79d   :  { %374 = vrot.lane.b32.xlu1 %v682_v10, %s742_s24 }
 0x7a1   :  { %379 = vrot.lane.b32.xlu1 %v371_v9, %s743_s25 }
 0x80f   :  { %v375_v11 = vpop.permute.xlu1 %374 }
 0x810   :  { %v377_v12 = vmul.f32 %v375_v11, %v355_v3 }
 0x812   :  { %384 = vrot.lane.b32.xlu0 %v377_v12, %s744_s26 }
 0x813   :  { %v380_v13 = vpop.permute.xlu1 %379 }
 0x814   :  { %382 = vst.msk [vmem:[#allocation3] sm:$0xf] %vm16_vm0, %v380_v13 }
 0x81b   :  { %v479_v14 = vld [vmem:[#allocation3] sm:$0xf] }
 0x81c   :  { %481 = vrot.lane.b32.xlu1 %v479_v14, %s742_s24 }
 0x884   :  { %v385_v15 = vpop.permute.xlu0 %384 }
 0x885   :  { %387 = vst.msk [vmem:[#allocation2] sm:$0xf] %vm16_vm0, %v385_v15  ;;  %558 = vst.msk [vmem:[%s913_s2 + $0x8] sm:$0xf] %vm16_vm0, %v385_v15 }
 0x88c   :  { %v392_v16 = vld [vmem:[#allocation2] sm:$0xf] }
 0x88d   :  { %625 = vmatmul.mubr.msk.f32.vlgmr.msra.gmra.mrb[2].mxu1 %vm28_vm2, %v392_v16 }
 0x88e   :  { %v482_v30 = vpop.permute.xlu1 %481 }
 0x960   :  { %v466_v19 = vpop.f32.mrb[2].mxu1 }
 0x961   :  { %v470_v20 = vadd.f32 %v559_v18, %v466_v19  ;;  %v626_v21 = vpop.f32.mrb[3].mxu1 }
 0x963   :  { %v561_v22 = vmul.f32 -1.442695, %v470_v20 }
 0x965   :  { %683 = vpow2.f32 %v561_v22 }
 0x966   :  { %685 = vtanh.f32 %v470_v20 }
 0x96f   :  { %v684_v23 = vpop.eup %683 }
 0x970   :  { %v474_v24 = vadd.f32 1.0, %v684_v23  ;;  %v686_v25 = vpop.eup %685 }
 0x972   :  { %687 = vrcp.f32 %v474_v24 }
 0x97c   :  { %v688_v26 = vpop.eup %687 }
 0x97d   :  { %v478_v27 = vsel %vm21_vm3, %v688_v26, %v686_v25 }
 0x97e   :  { %486 = vrot.lane.b32.xlu0 %v478_v27, %s742_s24  ;;  %v484_v31 = vmul.f32 %v482_v30, %v478_v27 }
 0x9f0   :  { %v487_v28 = vpop.permute.xlu0 %486 }
 0x9f1   :  { %v489_v29 = vmul.f32 %v487_v28, %v478_v27 }
 0x9f3   :  { %491 = vrot.lane.b32.xlu0 %v489_v29, %s742_s24 }
 0xa65   :  { %v492_v32 = vpop.permute.xlu0 %491 }
 0xa66   :  { %v494_v33 = vadd.f32 %v492_v32, %v484_v31 }
 0xa68   :  { %689 = vtanh.f32 %v494_v33  ;;  %502 = vrot.lane.b32.xlu0 %v494_v33, %s743_s25 }
 0xa72   :  { %v690_v34 = vpop.eup %689 }
 0xa73   :  { %497 = vrot.lane.b32.xlu1 %v690_v34, %s742_s24 }
 0xada   :  { %v503_v35 = vpop.permute.xlu0 %502 }
 0xadb   :  { %505 = vst.msk [vmem:[#allocation3] sm:$0xf] %vm16_vm0, %v503_v35 }
 0xae2   :  { %v515_v17 = vld [vmem:[#allocation3] sm:$0xf] }
 0xae3   :  { %516 = vst.msk [vmem:[#allocation6] sm:$0xf] %vm16_vm0, %v515_v17 }
 0xae4   :  { %702 = shalt.err (!%p699_p4)
}
 0xae5   :  { %s703_s17 = scalar_lea.hbm %s915_s4, 64 }
 0xae6   :  { %p704_p5 = scmp.ne.s32.totalorder %s915_s4, %s703_s17  ;;  %p707_p6 = scmp.lt.u32.totalorder %s703_s17, %s915_s4 }
 0xae8   :  { %p709_p7 = pnand %p707_p6, %p704_p5 }
 0xaea   :  { %712 = shalt.err (!%p709_p7)
}
 0xaeb   :  { %538 = dma.vmem_to_hbm [thread:$0]  %s536_s13, 64, %s915_s4, [#allocation7]   ;;  %v498_v36 = vpop.permute.xlu1 %497 }
 0xaec   :  { %v500_v37 = vmul.f32 %v498_v36, %v478_v27  ;;  %s746_s25 = smov [#allocation4]  }
 0xaed   :  { %s525_s27 = sshll.u32 %s746_s25, 4  ;;  %s526_s27 = int_to_ptr.vmem [resolvable:$true] %s525_s27 }
 0xaee   :  { %507 = vrot.lane.b32.xlu1 %v500_v37, %s744_s26  ;;  %s713_s28 = scalar_lea.vmem %s526_s27, 64  ;;  %p718_p9 = scmp.lt.s32.totalorder %s526_s27, %s526_s27 }
 0xaef   :  { %p714_p8 = scmp.ne.s32.totalorder %s526_s27, %s713_s28  ;;  %p719_p10 = scmp.lt.s32.totalorder %s713_s28, %s713_s28 }
 0xaf1   :  { %p720_p11 = por %p719_p10, %p718_p9 }
 0xaf3   :  { %p721_p12 = pnand %p720_p11, %p714_p8 }
 0xb60   :  { %v508_v38 = vpop.permute.xlu1 %507 }
 0xb61   :  { %510 = vst.msk [vmem:[#allocation2] sm:$0xf] %vm16_vm0, %v508_v38  ;;  %562 = vst.msk [vmem:[%s913_s2 + $0xc] sm:$0xf] %vm16_vm0, %v508_v38 }
 0xb68   :  { %v513_v39 = vld [vmem:[#allocation2] sm:$0xf] }
 0xb69   :  { %514 = vst.msk [vmem:[#allocation4] sm:$0xf] %vm16_vm0, %v513_v39 }
 0xb6a   :  { %724 = shalt.err (!%p721_p12)
}
 0xb6b   :  { %s725_s29 = scalar_lea.hbm %s914_s3, 64 }
 0xb6c   :  { %p726_p13 = scmp.ne.s32.totalorder %s914_s3, %s725_s29  ;;  %p729_p0 = scmp.lt.u32.totalorder %s725_s29, %s914_s3 }
 0xb6e   :  { %p731_p1 = pnand %p729_p0, %p726_p13 }
 0xb70   :  { %734 = shalt.err (!%p731_p1)
}
 0xb71   :  { %528 = dma.vmem_to_hbm [thread:$0]  %s526_s27, 64, %s914_s3, [#allocation5]  }
 0xb72   :  { %735 = dma.done.wait [#allocation5], 64  }
 0xb73   :  { %736 = vsyncadd [#allocation5], 4294967232 }
 0xb74   :  { %737 = dma.done.wait [#allocation7], 64  }
 0xb75   :  { %738 = vsyncadd [#allocation7], 4294967232 }
 0xb76   :  { %547 = vsyncpa [#allocation5], 1 }
 0xb77   :  { %548 = vsyncpa [#allocation7], 1 }

// kernel: drnn_forward.5
= control target key start
LH: loop header
LB: loop body
LE: loop exit
PB: predicated region body
PF: predicated region fallthrough
CT: control target
= control target key end

     0   :  { %10 = vsyncpa [#allocation5], 0  ;;  %vm16_vm0 = vcmask 261120   ;;  %v424_v3 = vmov 0.0|0.0   ;;  %v425_v6 = vmov 0.0   ;;  %s531_s0 = inlined_call_operand.vmem [shape: f32[2,8,128], index: 0, kind: input, shape index: {}]   ;;  %s532_s1 = inlined_call_operand.vmem [shape: f32[32,128], index: 1, kind: input, shape index: {}]   ;;  %s533_s2 = inlined_call_operand.vmem [shape: f32[2,8,32], index: 2, kind: output, shape index: {0}]   ;;  %s534_s3 = inlined_call_operand.hbm [shape: f32[8,32], index: 3, kind: output, shape index: {1}]   ;;  %s535_s4 = inlined_call_operand.hbm [shape: f32[8,32], index: 4, kind: output, shape index: {2}]  }
   0x1   :  { %v24_v0 = vld [vmem:[%s532_s1] sm:$0xff]  ;;  %v25_v1 = vld [vmem:[%s532_s1 + $0x8] sm:$0xff]  ;;  %v26_v2 = vld [vmem:[%s532_s1 + $0x10] sm:$0xff]  ;;  %340 = vmatprep.subr.bf16.mxu0 %v424_v3  ;;  %17 = vst.msk [vmem:[#allocation2] sm:$0xff] %vm16_vm0, %v425_v6  ;;  %346 = vmatprep.subr.bf16.mxu1 %v424_v3 }
   0x2   :  { %v341_v4 = vpack.c.bf16 %v25_v1, %v24_v0  ;;  %v27_v5 = vld [vmem:[%s532_s1 + $0x18] sm:$0xff]  ;;  %18 = vst.msk [vmem:[#allocation3] sm:$0xff] %vm16_vm0, %v425_v6 }
   0x3   :  { %11 = vsyncpa [#allocation7], 0  ;;  %vm426_vm1 = vmmov 0   ;;  %v344_v7 = vpack.c.bf16 %v27_v5, %v26_v2  ;;  %v22_v9 = vld [vmem:[%s531_s0] sm:$0xff]  ;;  %v19_v16 = vlaneseq  ;;  %s427_s24 = smov 32   ;;  %s428_s25 = smov 96  }
   0x4   :  { %326 = vmatprep.mubr.msk.f32.mxu0 %vm426_vm1, %v425_v6  ;;  %337 = vmatprep.mubr.msk.f32.mxu1 %vm426_vm1, %v425_v6  ;;  %s429_s26 = smov 64   ;;  %v304_v35 = vld [vmem:[%s531_s0 + $0x8] sm:$0xff]  ;;  %s430_s0 = smov [#allocation6]  }
   0x5   :  { %342 = vmatpush3.bf16.msra.mxu0 %v341_v4  ;;  %348 = vmatpush3.bf16.msra.mxu1 %v341_v4  ;;  %v20_v17 = vand.u32 127, %v19_v16  ;;  %s288_s5 = sshll.u32 %s430_s0, 4  ;;  %s289_s5 = int_to_ptr.vmem [resolvable:$true] %s288_s5 }
   0x6   :  { %343 = vmatprep.subr.bf16.mxu0 %v424_v3  ;;  %349 = vmatprep.subr.bf16.mxu1 %v424_v3  ;;  %s376_s6 = scalar_lea.vmem %s289_s5, 128  ;;  %p381_p1 = scmp.lt.s32.totalorder %s289_s5, %s289_s5 }
   0x7   :  { %vm21_vm2 = vcmp.lt.s32.totalorder %v20_v17, 96  ;;  %p377_p0 = scmp.ne.s32.totalorder %s289_s5, %s376_s6  ;;  %p382_p2 = scmp.lt.s32.totalorder %s376_s6, %s376_s6 }
   0x8   :  { %v23_v8 = vld [vmem:[#allocation2] sm:$0xff] }
   0x9   :  { %345 = vmatpush3.bf16.msra.mxu0 %v344_v7  ;;  %351 = vmatpush3.bf16.msra.mxu1 %v344_v7  ;;  %v110_v21 = vld [vmem:[#allocation3] sm:$0xff]  ;;  %p383_p3 = por %p382_p2, %p381_p1 }
   0xb   :  { %p384_p4 = pnand %p383_p3, %p377_p0 }
   0xc   :  { %327 = vmatmul.mubr.msk.f32.vlgmr.msra.gmra.mrb[0].mxu0 %vm16_vm0, %v23_v8 }
  0xdf   :  { %v97_v10 = vpop.f32.mrb[0].mxu0 }
  0xe0   :  { %v101_v11 = vadd.f32 %v97_v10, %v22_v9  ;;  %v328_v12 = vpop.f32.mrb[1].mxu0 }
  0xe2   :  { %v303_v13 = vmul.f32 -1.442695, %v101_v11 }
  0xe4   :  { %360 = vpow2.f32 %v303_v13 }
  0xe5   :  { %362 = vtanh.f32 %v101_v11 }
  0xee   :  { %v361_v14 = vpop.eup %360 }
  0xef   :  { %v105_v15 = vadd.f32 1.0, %v361_v14  ;;  %v363_v18 = vpop.eup %362 }
  0xf1   :  { %364 = vrcp.f32 %v105_v15 }
  0xfb   :  { %v365_v19 = vpop.eup %364 }
  0xfc   :  { %v109_v20 = vsel %vm21_vm2, %v365_v19, %v363_v18 }
  0xfd   :  { %117 = vrot.lane.b32.xlu0 %v109_v20, %s427_s24 }
 0x101   :  { %112 = vrot.lane.b32.xlu0 %v110_v21, %s427_s24 }
 0x16f   :  { %v118_v22 = vpop.permute.xlu0 %117 }
 0x170   :  { %v120_v23 = vmul.f32 %v118_v22, %v109_v20 }
 0x172   :  { %122 = vrot.lane.b32.xlu1 %v120_v23, %s427_s24 }
 0x173   :  { %v113_v24 = vpop.permute.xlu0 %112 }
 0x174   :  { %v115_v25 = vmul.f32 %v113_v24, %v109_v20 }
 0x1e4   :  { %v123_v26 = vpop.permute.xlu1 %122 }
 0x1e5   :  { %v125_v27 = vadd.f32 %v123_v26, %v115_v25 }
 0x1e7   :  { %366 = vtanh.f32 %v125_v27 }
 0x1f1   :  { %v367_v28 = vpop.eup %366 }
 0x1f2   :  { %128 = vrot.lane.b32.xlu1 %v367_v28, %s427_s24 }
 0x1f6   :  { %133 = vrot.lane.b32.xlu1 %v125_v27, %s428_s25 }
 0x264   :  { %v129_v29 = vpop.permute.xlu1 %128 }
 0x265   :  { %v131_v30 = vmul.f32 %v129_v29, %v109_v20 }
 0x267   :  { %138 = vrot.lane.b32.xlu0 %v131_v30, %s429_s26 }
 0x268   :  { %v134_v31 = vpop.permute.xlu1 %133 }
 0x269   :  { %136 = vst.msk [vmem:[#allocation3] sm:$0xff] %vm16_vm0, %v134_v31 }
 0x270   :  { %v232_v32 = vld [vmem:[#allocation3] sm:$0xff] }
 0x271   :  { %234 = vrot.lane.b32.xlu1 %v232_v32, %s427_s24 }
 0x2d9   :  { %v139_v33 = vpop.permute.xlu0 %138 }
 0x2da   :  { %141 = vst.msk [vmem:[#allocation2] sm:$0xff] %vm16_vm0, %v139_v33  ;;  %142 = vst.msk [vmem:[%s533_s2] sm:$0xff] %vm16_vm0, %v139_v33 }
 0x2e1   :  { %v145_v34 = vld [vmem:[#allocation2] sm:$0xff] }
 0x2e2   :  { %338 = vmatmul.mubr.msk.f32.vlgmr.msra.gmra.mrb[0].mxu1 %vm16_vm0, %v145_v34 }
 0x2e3   :  { %v235_v47 = vpop.permute.xlu1 %234 }
 0x3b5   :  { %v219_v36 = vpop.f32.mrb[0].mxu1 }
 0x3b6   :  { %v223_v37 = vadd.f32 %v304_v35, %v219_v36  ;;  %v339_v38 = vpop.f32.mrb[1].mxu1 }
 0x3b8   :  { %v306_v39 = vmul.f32 -1.442695, %v223_v37 }
 0x3ba   :  { %368 = vpow2.f32 %v306_v39 }
 0x3bb   :  { %370 = vtanh.f32 %v223_v37 }
 0x3c4   :  { %v369_v40 = vpop.eup %368 }
 0x3c5   :  { %v227_v41 = vadd.f32 1.0, %v369_v40  ;;  %v371_v42 = vpop.eup %370 }
 0x3c7   :  { %372 = vrcp.f32 %v227_v41 }
 0x3d1   :  { %v373_v43 = vpop.eup %372 }
 0x3d2   :  { %v231_v44 = vsel %vm21_vm2, %v373_v43, %v371_v42 }
 0x3d3   :  { %239 = vrot.lane.b32.xlu0 %v231_v44, %s427_s24  ;;  %v237_v48 = vmul.f32 %v235_v47, %v231_v44 }
 0x445   :  { %v240_v45 = vpop.permute.xlu0 %239 }
 0x446   :  { %v242_v46 = vmul.f32 %v240_v45, %v231_v44 }
 0x448   :  { %244 = vrot.lane.b32.xlu0 %v242_v46, %s427_s24 }
 0x4ba   :  { %v245_v49 = vpop.permute.xlu0 %244 }
 0x4bb   :  { %v247_v50 = vadd.f32 %v245_v49, %v237_v48 }
 0x4bd   :  { %374 = vtanh.f32 %v247_v50  ;;  %255 = vrot.lane.b32.xlu0 %v247_v50, %s428_s25 }
 0x4c7   :  { %v375_v51 = vpop.eup %374 }
 0x4c8   :  { %250 = vrot.lane.b32.xlu1 %v375_v51, %s427_s24 }
 0x52f   :  { %v256_v52 = vpop.permute.xlu0 %255 }
 0x530   :  { %258 = vst.msk [vmem:[#allocation3] sm:$0xff] %vm16_vm0, %v256_v52 }
 0x537   :  { %v268_v53 = vld [vmem:[#allocation3] sm:$0xff] }
 0x538   :  { %269 = vst.msk [vmem:[#allocation6] sm:$0xff] %vm16_vm0, %v268_v53 }
 0x539   :  { %387 = shalt.err (!%p384_p4)
}
 0x53a   :  { %s388_s9 = scalar_lea.hbm %s535_s4, 128 }
 0x53b   :  { %p389_p5 = scmp.ne.s32.totalorder %s535_s4, %s388_s9  ;;  %p392_p6 = scmp.lt.u32.totalorder %s388_s9, %s535_s4 }
 0x53d   :  { %p394_p7 = pnand %p392_p6, %p389_p5 }
 0x53f   :  { %397 = shalt.err (!%p394_p7)
}
 0x540   :  { %291 = dma.vmem_to_hbm [thread:$0]  %s289_s5, 128, %s535_s4, [#allocation7]   ;;  %v251_v54 = vpop.permute.xlu1 %250 }
 0x541   :  { %v253_v55 = vmul.f32 %v251_v54, %v231_v44  ;;  %s431_s18 = smov [#allocation4]  }
 0x542   :  { %s278_s19 = sshll.u32 %s431_s18, 4  ;;  %s279_s19 = int_to_ptr.vmem [resolvable:$true] %s278_s19 }
 0x543   :  { %260 = vrot.lane.b32.xlu1 %v253_v55, %s429_s26  ;;  %s398_s20 = scalar_lea.vmem %s279_s19, 128  ;;  %p403_p9 = scmp.lt.s32.totalorder %s279_s19, %s279_s19 }
 0x544   :  { %p399_p8 = scmp.ne.s32.totalorder %s279_s19, %s398_s20  ;;  %p404_p10 = scmp.lt.s32.totalorder %s398_s20, %s398_s20 }
 0x546   :  { %p405_p11 = por %p404_p10, %p403_p9 }
 0x548   :  { %p406_p12 = pnand %p405_p11, %p399_p8 }
 0x5b5   :  { %v261_v56 = vpop.permute.xlu1 %260 }
 0x5b6   :  { %263 = vst.msk [vmem:[#allocation2] sm:$0xff] %vm16_vm0, %v261_v56  ;;  %307 = vst.msk [vmem:[%s533_s2 + $0x8] sm:$0xff] %vm16_vm0, %v261_v56 }
 0x5bd   :  { %v266_v57 = vld [vmem:[#allocation2] sm:$0xff] }
 0x5be   :  { %267 = vst.msk [vmem:[#allocation4] sm:$0xff] %vm16_vm0, %v266_v57 }
 0x5bf   :  { %409 = shalt.err (!%p406_p12)
}
 0x5c0   :  { %s410_s22 = scalar_lea.hbm %s534_s3, 128 }
 0x5c1   :  { %p411_p13 = scmp.ne.s32.totalorder %s534_s3, %s410_s22  ;;  %p414_p0 = scmp.lt.u32.totalorder %s410_s22, %s534_s3 }
 0x5c3   :  { %p416_p1 = pnand %p414_p0, %p411_p13 }
 0x5c5   :  { %419 = shalt.err (!%p416_p1)
}
 0x5c6   :  { %281 = dma.vmem_to_hbm [thread:$0]  %s279_s19, 128, %s534_s3, [#allocation5]  }
 0x5c7   :  { %420 = dma.done.wait [#allocation5], 128  }
 0x5c8   :  { %421 = vsyncadd [#allocation5], 4294967168 }
 0x5c9   :  { %422 = dma.done.wait [#allocation7], 128  }
 0x5ca   :  { %423 = vsyncadd [#allocation7], 4294967168 }
 0x5cb   :  { %300 = vsyncpa [#allocation5], 1 }
 0x5cc   :  { %301 = vsyncpa [#allocation7], 1 }

// kernel: drnn_forward.3
= control target key start
LH: loop header
LB: loop body
LE: loop exit
PB: predicated region body
PF: predicated region fallthrough
CT: control target
= control target key end

     0   :  { %10 = vsyncpa [#allocation5], 0  ;;  %vm16_vm0 = vcmask 254976   ;;  %v1367_v3 = vmov 0.0|0.0   ;;  %v1368_v6 = vmov 0.0   ;;  %vm1369_vm1 = vmmov 0   ;;  %s1641_s0 = inlined_call_operand.vmem [shape: f32[8,2,128], index: 0, kind: input, shape index: {}]   ;;  %s1642_s1 = inlined_call_operand.vmem [shape: f32[32,128], index: 1, kind: input, shape index: {}]   ;;  %s1643_s2 = inlined_call_operand.vmem [shape: f32[8,2,32], index: 2, kind: output, shape index: {0}]   ;;  %s1644_s3 = inlined_call_operand.hbm [shape: f32[2,32], index: 3, kind: output, shape index: {1}]   ;;  %s1645_s4 = inlined_call_operand.hbm [shape: f32[2,32], index: 4, kind: output, shape index: {2}]  }
   0x1   :  { %v24_v0 = vld [vmem:[%s1642_s1] sm:$0xff]  ;;  %v25_v1 = vld [vmem:[%s1642_s1 + $0x8] sm:$0xff]  ;;  %v26_v2 = vld [vmem:[%s1642_s1 + $0x10] sm:$0xff]  ;;  %1199 = vmatprep.subr.bf16.mxu0 %v1367_v3  ;;  %17 = vst.msk [vmem:[#allocation2] sm:$0x3] %vm16_vm0, %v1368_v6  ;;  %1205 = vmatprep.subr.bf16.mxu1 %v1367_v3 }
   0x2   :  { %v1410_v4 = vpack.c.bf16 %v25_v1, %v24_v0  ;;  %v27_v5 = vld [vmem:[%s1642_s1 + $0x18] sm:$0xff]  ;;  %18 = vst.msk [vmem:[#allocation3] sm:$0x3] %vm16_vm0, %v1368_v6  ;;  %1119 = vmatprep.mubr.msk.f32.mxu0 %vm1369_vm1, %v1368_v6  ;;  %1130 = vmatprep.mubr.msk.f32.mxu1 %vm1369_vm1, %v1368_v6 }
   0x3   :  { %11 = vsyncpa [#allocation7], 0  ;;  %v1425_v7 = vpack.c.bf16 %v27_v5, %v26_v2  ;;  %vm28_vm2 = vcmask 261120   ;;  %v22_v9 = vld [vmem:[%s1641_s0] sm:$0x3]  ;;  %v19_v16 = vlaneseq  ;;  %s1370_s24 = smov 32  }
   0x4   :  { %1201 = vmatpush3.bf16.msra.mxu0 %v1410_v4  ;;  %1207 = vmatpush3.bf16.msra.mxu1 %v1410_v4  ;;  %s1371_s25 = smov 96   ;;  %s1372_s26 = smov 64   ;;  %v1043_v35 = vld [vmem:[%s1641_s0 + $0x2] sm:$0x3]  ;;  %v1047_v58 = vld [vmem:[%s1641_s0 + $0x4] sm:$0x3] }
   0x5   :  { %1202 = vmatprep.subr.bf16.mxu0 %v1367_v3  ;;  %1208 = vmatprep.subr.bf16.mxu1 %v1367_v3  ;;  %v1444_v17 = vand.u32 127, %v19_v16 }
   0x7   :  { %vm21_vm3 = vcmp.lt.s32.totalorder %v1444_v17, 96 }
   0x8   :  { %1204 = vmatpush3.bf16.msra.mxu0 %v1425_v7  ;;  %1210 = vmatpush3.bf16.msra.mxu1 %v1425_v7  ;;  %v23_v8 = vld [vmem:[#allocation2] sm:$0x3] }
   0x9   :  { %1211 = vmatprep.subr.bf16.mxu0 %v1367_v3  ;;  %1217 = vmatprep.subr.bf16.mxu1 %v1367_v3  ;;  %v111_v21 = vld [vmem:[#allocation3] sm:$0x3] }
   0xb   :  { %1120 = vmatmul.mubr.msk.f32.vlgmr.msra.gmra.mrb[0].mxu0 %vm28_vm2, %v23_v8 }
   0xc   :  { %1213 = vmatpush3.bf16.msra.mxu0 %v1410_v4  ;;  %1141 = vmatprep.mubr.msk.f32.mxu0 %vm1369_vm1, %v1368_v6 }
   0xd   :  { %1214 = vmatprep.subr.bf16.mxu0 %v1367_v3 }
  0x10   :  { %1216 = vmatpush3.bf16.msra.mxu0 %v1425_v7 }
  0x11   :  { %1223 = vmatprep.subr.bf16.mxu0 %v1367_v3 }
  0xde   :  { %v98_v10 = vpop.f32.mrb[0].mxu0 }
  0xdf   :  { %v102_v11 = vadd.f32 %v98_v10, %v22_v9  ;;  %v1121_v12 = vpop.f32.mrb[1].mxu0 }
  0xe1   :  { %v1042_v13 = vmul.f32 -1.442695, %v102_v11 }
  0xe3   :  { %1255 = vpow2.f32 %v1042_v13 }
  0xe4   :  { %1257 = vtanh.f32 %v102_v11 }
  0xed   :  { %v1256_v14 = vpop.eup %1255 }
  0xee   :  { %v106_v15 = vadd.f32 1.0, %v1256_v14  ;;  %v1258_v18 = vpop.eup %1257 }
  0xf0   :  { %1259 = vrcp.f32 %v106_v15 }
  0xfa   :  { %v1260_v19 = vpop.eup %1259 }
  0xfb   :  { %v110_v20 = vsel %vm21_vm3, %v1260_v19, %v1258_v18 }
  0xfc   :  { %118 = vrot.lane.b32.xlu0 %v110_v20, %s1370_s24 }
 0x100   :  { %113 = vrot.lane.b32.xlu0 %v111_v21, %s1370_s24 }
 0x16e   :  { %v119_v22 = vpop.permute.xlu0 %118 }
 0x16f   :  { %v121_v23 = vmul.f32 %v119_v22, %v110_v20  ;;  %v1051_v22 = vld [vmem:[%s1641_s0 + $0x6] sm:$0x3] }
 0x171   :  { %123 = vrot.lane.b32.xlu1 %v121_v23, %s1370_s24 }
 0x172   :  { %v114_v24 = vpop.permute.xlu0 %113 }
 0x173   :  { %v116_v25 = vmul.f32 %v114_v24, %v110_v20 }
 0x1e3   :  { %v124_v26 = vpop.permute.xlu1 %123 }
 0x1e4   :  { %v126_v27 = vadd.f32 %v124_v26, %v116_v25 }
 0x1e6   :  { %1261 = vtanh.f32 %v126_v27 }
 0x1f0   :  { %v1262_v28 = vpop.eup %1261 }
 0x1f1   :  { %129 = vrot.lane.b32.xlu1 %v1262_v28, %s1370_s24 }
 0x1f5   :  { %134 = vrot.lane.b32.xlu1 %v126_v27, %s1371_s25 }
 0x263   :  { %v130_v29 = vpop.permute.xlu1 %129 }
 0x264   :  { %v132_v30 = vmul.f32 %v130_v29, %v110_v20 }
 0x266   :  { %139 = vrot.lane.b32.xlu0 %v132_v30, %s1372_s26 }
 0x267   :  { %v135_v31 = vpop.permute.xlu1 %134 }
 0x268   :  { %137 = vst.msk [vmem:[#allocation3] sm:$0x3] %vm16_vm0, %v135_v31 }
 0x26f   :  { %v233_v32 = vld [vmem:[#allocation3] sm:$0x3] }
 0x270   :  { %235 = vrot.lane.b32.xlu1 %v233_v32, %s1370_s24 }
 0x2d8   :  { %v140_v33 = vpop.permute.xlu0 %139 }
 0x2d9   :  { %142 = vst.msk [vmem:[#allocation2] sm:$0x3] %vm16_vm0, %v140_v33  ;;  %143 = vst.msk [vmem:[%s1643_s2] sm:$0x3] %vm16_vm0, %v140_v33 }
 0x2e0   :  { %v146_v34 = vld [vmem:[#allocation2] sm:$0x3] }
 0x2e1   :  { %1131 = vmatmul.mubr.msk.f32.vlgmr.msra.gmra.mrb[0].mxu1 %vm28_vm2, %v146_v34 }
 0x2e2   :  { %1219 = vmatpush3.bf16.msra.mxu1 %v1410_v4  ;;  %1152 = vmatprep.mubr.msk.f32.mxu1 %vm1369_vm1, %v1368_v6  ;;  %v236_v47 = vpop.permute.xlu1 %235 }
 0x2e3   :  { %1220 = vmatprep.subr.bf16.mxu1 %v1367_v3 }
 0x2e6   :  { %1222 = vmatpush3.bf16.msra.mxu1 %v1425_v7 }
 0x2e7   :  { %1229 = vmatprep.subr.bf16.mxu1 %v1367_v3 }
 0x3b4   :  { %v220_v36 = vpop.f32.mrb[0].mxu1 }
 0x3b5   :  { %v224_v37 = vadd.f32 %v1043_v35, %v220_v36  ;;  %v1132_v38 = vpop.f32.mrb[1].mxu1 }
 0x3b7   :  { %v1045_v39 = vmul.f32 -1.442695, %v224_v37 }
 0x3b9   :  { %1263 = vpow2.f32 %v1045_v39 }
 0x3ba   :  { %1265 = vtanh.f32 %v224_v37 }
 0x3c3   :  { %v1264_v40 = vpop.eup %1263 }
 0x3c4   :  { %v228_v41 = vadd.f32 1.0, %v1264_v40  ;;  %v1266_v42 = vpop.eup %1265 }
 0x3c6   :  { %1267 = vrcp.f32 %v228_v41 }
 0x3d0   :  { %v1268_v43 = vpop.eup %1267 }
 0x3d1   :  { %v232_v44 = vsel %vm21_vm3, %v1268_v43, %v1266_v42 }
 0x3d2   :  { %240 = vrot.lane.b32.xlu0 %v232_v44, %s1370_s24  ;;  %v238_v48 = vmul.f32 %v236_v47, %v232_v44 }
 0x444   :  { %v241_v45 = vpop.permute.xlu0 %240 }
 0x445   :  { %v243_v46 = vmul.f32 %v241_v45, %v232_v44  ;;  %v1055_v45 = vld [vmem:[%s1641_s0 + $0x8] sm:$0x3] }
 0x447   :  { %245 = vrot.lane.b32.xlu0 %v243_v46, %s1370_s24 }
 0x4b9   :  { %v246_v49 = vpop.permute.xlu0 %245 }
 0x4ba   :  { %v248_v50 = vadd.f32 %v246_v49, %v238_v48 }
 0x4bc   :  { %1269 = vtanh.f32 %v248_v50 }
 0x4c6   :  { %v1270_v51 = vpop.eup %1269 }
 0x4c7   :  { %251 = vrot.lane.b32.xlu1 %v1270_v51, %s1370_s24 }
 0x4cb   :  { %256 = vrot.lane.b32.xlu1 %v248_v50, %s1371_s25 }
 0x539   :  { %v252_v52 = vpop.permute.xlu1 %251 }
 0x53a   :  { %v254_v53 = vmul.f32 %v252_v52, %v232_v44 }
 0x53c   :  { %261 = vrot.lane.b32.xlu0 %v254_v53, %s1372_s26 }
 0x53d   :  { %v257_v54 = vpop.permute.xlu1 %256 }
 0x53e   :  { %259 = vst.msk [vmem:[#allocation3] sm:$0x3] %vm16_vm0, %v257_v54 }
 0x545   :  { %v356_v55 = vld [vmem:[#allocation3] sm:$0x3] }
 0x546   :  { %358 = vrot.lane.b32.xlu1 %v356_v55, %s1370_s24 }
 0x5ae   :  { %v262_v56 = vpop.permute.xlu0 %261 }
 0x5af   :  { %264 = vst.msk [vmem:[#allocation2] sm:$0x3] %vm16_vm0, %v262_v56  ;;  %1046 = vst.msk [vmem:[%s1643_s2 + $0x2] sm:$0x3] %vm16_vm0, %v262_v56 }
 0x5b6   :  { %v269_v57 = vld [vmem:[#allocation2] sm:$0x3] }
 0x5b7   :  { %1142 = vmatmul.mubr.msk.f32.vlgmr.msra.gmra.mrb[2].mxu0 %vm28_vm2, %v269_v57 }
 0x5b8   :  { %1225 = vmatpush3.bf16.msra.mxu0 %v1410_v4  ;;  %1163 = vmatprep.mubr.msk.f32.mxu0 %vm1369_vm1, %v1368_v6  ;;  %v359_v10 = vpop.permute.xlu1 %358 }
 0x5b9   :  { %1226 = vmatprep.subr.bf16.mxu0 %v1367_v3 }
 0x5bc   :  { %1228 = vmatpush3.bf16.msra.mxu0 %v1425_v7 }
 0x5bd   :  { %1235 = vmatprep.subr.bf16.mxu0 %v1367_v3 }
 0x68a   :  { %v343_v59 = vpop.f32.mrb[2].mxu0 }
 0x68b   :  { %v347_v60 = vadd.f32 %v1047_v58, %v343_v59  ;;  %v1143_v61 = vpop.f32.mrb[3].mxu0 }
 0x68d   :  { %v1049_v62 = vmul.f32 -1.442695, %v347_v60 }
 0x68f   :  { %1271 = vpow2.f32 %v1049_v62 }
 0x690   :  { %1273 = vtanh.f32 %v347_v60 }
 0x699   :  { %v1272_v63 = vpop.eup %1271 }
 0x69a   :  { %v351_v0 = vadd.f32 1.0, %v1272_v63  ;;  %v1274_v1 = vpop.eup %1273 }
 0x69c   :  { %1275 = vrcp.f32 %v351_v0 }
 0x6a6   :  { %v1276_v2 = vpop.eup %1275 }
 0x6a7   :  { %v355_v5 = vsel %vm21_vm3, %v1276_v2, %v1274_v1 }
 0x6a8   :  { %363 = vrot.lane.b32.xlu0 %v355_v5, %s1370_s24  ;;  %v361_v11 = vmul.f32 %v359_v10, %v355_v5 }
 0x71a   :  { %v364_v8 = vpop.permute.xlu0 %363 }
 0x71b   :  { %v366_v9 = vmul.f32 %v364_v8, %v355_v5  ;;  %v1059_v8 = vld [vmem:[%s1641_s0 + $0xa] sm:$0x3] }
 0x71d   :  { %368 = vrot.lane.b32.xlu0 %v366_v9, %s1370_s24 }
 0x78f   :  { %v369_v12 = vpop.permute.xlu0 %368 }
 0x790   :  { %v371_v13 = vadd.f32 %v369_v12, %v361_v11 }
 0x792   :  { %1277 = vtanh.f32 %v371_v13 }
 0x79c   :  { %v1278_v14 = vpop.eup %1277 }
 0x79d   :  { %374 = vrot.lane.b32.xlu1 %v1278_v14, %s1370_s24 }
 0x7a1   :  { %379 = vrot.lane.b32.xlu1 %v371_v13, %s1371_s25 }
 0x80f   :  { %v375_v15 = vpop.permute.xlu1 %374 }
 0x810   :  { %v377_v16 = vmul.f32 %v375_v15, %v355_v5 }
 0x812   :  { %384 = vrot.lane.b32.xlu0 %v377_v16, %s1372_s26 }
 0x813   :  { %v380_v18 = vpop.permute.xlu1 %379 }
 0x814   :  { %382 = vst.msk [vmem:[#allocation3] sm:$0x3] %vm16_vm0, %v380_v18 }
 0x81b   :  { %v479_v19 = vld [vmem:[#allocation3] sm:$0x3] }
 0x81c   :  { %481 = vrot.lane.b32.xlu1 %v479_v19, %s1370_s24 }
 0x884   :  { %v385_v20 = vpop.permute.xlu0 %384 }
 0x885   :  { %387 = vst.msk [vmem:[#allocation2] sm:$0x3] %vm16_vm0, %v385_v20  ;;  %1050 = vst.msk [vmem:[%s1643_s2 + $0x4] sm:$0x3] %vm16_vm0, %v385_v20 }
 0x88c   :  { %v392_v21 = vld [vmem:[#allocation2] sm:$0x3] }
 0x88d   :  { %1153 = vmatmul.mubr.msk.f32.vlgmr.msra.gmra.mrb[2].mxu1 %vm28_vm2, %v392_v21 }
 0x88e   :  { %1231 = vmatpush3.bf16.msra.mxu1 %v1410_v4  ;;  %1174 = vmatprep.mubr.msk.f32.mxu1 %vm1369_vm1, %v1368_v6  ;;  %v482_v34 = vpop.permute.xlu1 %481 }
 0x88f   :  { %1232 = vmatprep.subr.bf16.mxu1 %v1367_v3 }
 0x892   :  { %1234 = vmatpush3.bf16.msra.mxu1 %v1425_v7 }
 0x893   :  { %1241 = vmatprep.subr.bf16.mxu1 %v1367_v3 }
 0x960   :  { %v466_v23 = vpop.f32.mrb[2].mxu1 }
 0x961   :  { %v470_v24 = vadd.f32 %v1051_v22, %v466_v23  ;;  %v1154_v25 = vpop.f32.mrb[3].mxu1 }
 0x963   :  { %v1053_v26 = vmul.f32 -1.442695, %v470_v24 }
 0x965   :  { %1279 = vpow2.f32 %v1053_v26 }
 0x966   :  { %1281 = vtanh.f32 %v470_v24 }
 0x96f   :  { %v1280_v27 = vpop.eup %1279 }
 0x970   :  { %v474_v28 = vadd.f32 1.0, %v1280_v27  ;;  %v1282_v29 = vpop.eup %1281 }
 0x972   :  { %1283 = vrcp.f32 %v474_v28  ;;  %v1063_v28 = vld [vmem:[%s1641_s0 + $0xc] sm:$0x3] }
 0x97c   :  { %v1284_v30 = vpop.eup %1283 }
 0x97d   :  { %v478_v31 = vsel %vm21_vm3, %v1284_v30, %v1282_v29 }
 0x97e   :  { %486 = vrot.lane.b32.xlu0 %v478_v31, %s1370_s24  ;;  %v484_v35 = vmul.f32 %v482_v34, %v478_v31 }
 0x9f0   :  { %v487_v32 = vpop.permute.xlu0 %486 }
 0x9f1   :  { %v489_v33 = vmul.f32 %v487_v32, %v478_v31 }
 0x9f3   :  { %491 = vrot.lane.b32.xlu0 %v489_v33, %s1370_s24 }
 0xa65   :  { %v492_v36 = vpop.permute.xlu0 %491 }
 0xa66   :  { %v494_v37 = vadd.f32 %v492_v36, %v484_v35 }
 0xa68   :  { %1285 = vtanh.f32 %v494_v37 }
 0xa72   :  { %v1286_v38 = vpop.eup %1285 }
 0xa73   :  { %497 = vrot.lane.b32.xlu1 %v1286_v38, %s1370_s24 }
 0xa77   :  { %502 = vrot.lane.b32.xlu1 %v494_v37, %s1371_s25 }
 0xae5   :  { %v498_v39 = vpop.permute.xlu1 %497 }
 0xae6   :  { %v500_v40 = vmul.f32 %v498_v39, %v478_v31 }
 0xae8   :  { %507 = vrot.lane.b32.xlu0 %v500_v40, %s1372_s26 }
 0xae9   :  { %v503_v41 = vpop.permute.xlu1 %502 }
 0xaea   :  { %505 = vst.msk [vmem:[#allocation3] sm:$0x3] %vm16_vm0, %v503_v41 }
 0xaf1   :  { %v602_v42 = vld [vmem:[#allocation3] sm:$0x3] }
 0xaf2   :  { %604 = vrot.lane.b32.xlu1 %v602_v42, %s1370_s24 }
 0xb5a   :  { %v508_v43 = vpop.permute.xlu0 %507 }
 0xb5b   :  { %510 = vst.msk [vmem:[#allocation2] sm:$0x3] %vm16_vm0, %v508_v43  ;;  %1054 = vst.msk [vmem:[%s1643_s2 + $0x6] sm:$0x3] %vm16_vm0, %v508_v43 }
 0xb62   :  { %v515_v44 = vld [vmem:[#allocation2] sm:$0x3] }
 0xb63   :  { %1164 = vmatmul.mubr.msk.f32.vlgmr.msra.gmra.mrb[4].mxu0 %vm28_vm2, %v515_v44 }
 0xb64   :  { %1237 = vmatpush3.bf16.msra.mxu0 %v1410_v4  ;;  %1185 = vmatprep.mubr.msk.f32.mxu0 %vm1369_vm1, %v1368_v6  ;;  %v605_v57 = vpop.permute.xlu1 %604 }
 0xb65   :  { %1238 = vmatprep.subr.bf16.mxu0 %v1367_v3 }
 0xb68   :  { %1240 = vmatpush3.bf16.msra.mxu0 %v1425_v7 }
 0xc36   :  { %v589_v46 = vpop.f32.mrb[4].mxu0 }
 0xc37   :  { %v593_v47 = vadd.f32 %v1055_v45, %v589_v46  ;;  %v1165_v48 = vpop.f32.mrb[5].mxu0 }
 0xc39   :  { %v1057_v49 = vmul.f32 -1.442695, %v593_v47 }
 0xc3b   :  { %1287 = vpow2.f32 %v1057_v49 }
 0xc3c   :  { %1289 = vtanh.f32 %v593_v47 }
 0xc45   :  { %v1288_v50 = vpop.eup %1287 }
 0xc46   :  { %v597_v51 = vadd.f32 1.0, %v1288_v50  ;;  %v1290_v52 = vpop.eup %1289 }
 0xc48   :  { %1291 = vrcp.f32 %v597_v51  ;;  %v1067_v51 = vld [vmem:[%s1641_s0 + $0xe] sm:$0x3]  ;;  %s1373_s0 = smov [#allocation6]  }
 0xc49   :  { %s1027_s5 = sshll.u32 %s1373_s0, 4  ;;  %s1028_s5 = int_to_ptr.vmem [resolvable:$true] %s1027_s5 }
 0xc4a   :  { %s1319_s6 = scalar_lea.vmem %s1028_s5, 32  ;;  %p1324_p1 = scmp.lt.s32.totalorder %s1028_s5, %s1028_s5 }
 0xc4b   :  { %p1320_p0 = scmp.ne.s32.totalorder %s1028_s5, %s1319_s6  ;;  %p1325_p2 = scmp.lt.s32.totalorder %s1319_s6, %s1319_s6 }
 0xc4d   :  { %p1326_p3 = por %p1325_p2, %p1324_p1 }
 0xc4f   :  { %p1327_p4 = pnand %p1326_p3, %p1320_p0 }
 0xc52   :  { %v1292_v53 = vpop.eup %1291 }
 0xc53   :  { %v601_v54 = vsel %vm21_vm3, %v1292_v53, %v1290_v52 }
 0xc54   :  { %609 = vrot.lane.b32.xlu0 %v601_v54, %s1370_s24  ;;  %v607_v58 = vmul.f32 %v605_v57, %v601_v54 }
 0xcc6   :  { %v610_v55 = vpop.permute.xlu0 %609 }
 0xcc7   :  { %v612_v56 = vmul.f32 %v610_v55, %v601_v54 }
 0xcc9   :  { %614 = vrot.lane.b32.xlu0 %v612_v56, %s1370_s24 }
 0xd3b   :  { %v615_v59 = vpop.permute.xlu0 %614 }
 0xd3c   :  { %v617_v60 = vadd.f32 %v615_v59, %v607_v58 }
 0xd3e   :  { %1293 = vtanh.f32 %v617_v60 }
 0xd48   :  { %v1294_v61 = vpop.eup %1293 }
 0xd49   :  { %620 = vrot.lane.b32.xlu1 %v1294_v61, %s1370_s24 }
 0xd4d   :  { %625 = vrot.lane.b32.xlu1 %v617_v60, %s1371_s25 }
 0xdbb   :  { %v621_v62 = vpop.permute.xlu1 %620 }
 0xdbc   :  { %v623_v63 = vmul.f32 %v621_v62, %v601_v54 }
 0xdbe   :  { %630 = vrot.lane.b32.xlu0 %v623_v63, %s1372_s26 }
 0xdbf   :  { %v626_v0 = vpop.permute.xlu1 %625 }
 0xdc0   :  { %628 = vst.msk [vmem:[#allocation3] sm:$0x3] %vm16_vm0, %v626_v0 }
 0xdc7   :  { %v725_v1 = vld [vmem:[#allocation3] sm:$0x3] }
 0xdc8   :  { %727 = vrot.lane.b32.xlu1 %v725_v1, %s1370_s24 }
 0xe30   :  { %v631_v2 = vpop.permute.xlu0 %630 }
 0xe31   :  { %633 = vst.msk [vmem:[#allocation2] sm:$0x3] %vm16_vm0, %v631_v2  ;;  %1058 = vst.msk [vmem:[%s1643_s2 + $0x8] sm:$0x3] %vm16_vm0, %v631_v2 }
 0xe38   :  { %v638_v5 = vld [vmem:[#allocation2] sm:$0x3] }
 0xe39   :  { %1175 = vmatmul.mubr.msk.f32.vlgmr.msra.gmra.mrb[4].mxu1 %vm28_vm2, %v638_v5 }
 0xe3a   :  { %1243 = vmatpush3.bf16.msra.mxu1 %v1410_v4  ;;  %1196 = vmatprep.mubr.msk.f32.mxu1 %vm1369_vm1, %v1368_v6  ;;  %v728_v16 = vpop.permute.xlu1 %727 }
 0xe3b   :  { %1244 = vmatprep.subr.bf16.mxu1 %v1367_v3 }
 0xe3e   :  { %1246 = vmatpush3.bf16.msra.mxu1 %v1425_v7 }
 0xf0c   :  { %v712_v9 = vpop.f32.mrb[4].mxu1 }
 0xf0d   :  { %v716_v10 = vadd.f32 %v1059_v8, %v712_v9  ;;  %v1176_v11 = vpop.f32.mrb[5].mxu1 }
 0xf0f   :  { %v1061_v12 = vmul.f32 -1.442695, %v716_v10 }
 0xf11   :  { %1295 = vpow2.f32 %v1061_v12 }
 0xf12   :  { %1297 = vtanh.f32 %v716_v10 }
 0xf1b   :  { %v1296_v13 = vpop.eup %1295 }
 0xf1c   :  { %v720_v14 = vadd.f32 1.0, %v1296_v13  ;;  %v1298_v4 = vpop.eup %1297 }
 0xf1e   :  { %1299 = vrcp.f32 %v720_v14 }
 0xf28   :  { %v1300_v15 = vpop.eup %1299 }
 0xf29   :  { %v724_v3 = vsel %vm21_vm3, %v1300_v15, %v1298_v4 }
 0xf2a   :  { %732 = vrot.lane.b32.xlu0 %v724_v3, %s1370_s24  ;;  %v730_v18 = vmul.f32 %v728_v16, %v724_v3 }
 0xf9c   :  { %v733_v6 = vpop.permute.xlu0 %732 }
 0xf9d   :  { %v735_v7 = vmul.f32 %v733_v6, %v724_v3 }
 0xf9f   :  { %737 = vrot.lane.b32.xlu0 %v735_v7, %s1370_s24 }
0x1011   :  { %v738_v19 = vpop.permute.xlu0 %737 }
0x1012   :  { %v740_v20 = vadd.f32 %v738_v19, %v730_v18 }
0x1014   :  { %1301 = vtanh.f32 %v740_v20 }
0x101e   :  { %v1302_v21 = vpop.eup %1301 }
0x101f   :  { %743 = vrot.lane.b32.xlu1 %v1302_v21, %s1370_s24 }
0x1023   :  { %748 = vrot.lane.b32.xlu1 %v740_v20, %s1371_s25 }
0x1091   :  { %v744_v22 = vpop.permute.xlu1 %743 }
0x1092   :  { %v746_v23 = vmul.f32 %v744_v22, %v724_v3 }
0x1094   :  { %753 = vrot.lane.b32.xlu0 %v746_v23, %s1372_s26 }
0x1095   :  { %v749_v24 = vpop.permute.xlu1 %748 }
0x1096   :  { %751 = vst.msk [vmem:[#allocation3] sm:$0x3] %vm16_vm0, %v749_v24 }
0x109d   :  { %v848_v25 = vld [vmem:[#allocation3] sm:$0x3] }
0x109e   :  { %850 = vrot.lane.b32.xlu1 %v848_v25, %s1370_s24 }
0x1106   :  { %v754_v26 = vpop.permute.xlu0 %753 }
0x1107   :  { %756 = vst.msk [vmem:[#allocation2] sm:$0x3] %vm16_vm0, %v754_v26  ;;  %1062 = vst.msk [vmem:[%s1643_s2 + $0xa] sm:$0x3] %vm16_vm0, %v754_v26 }
0x110e   :  { %v761_v27 = vld [vmem:[#allocation2] sm:$0x3] }
0x110f   :  { %1186 = vmatmul.mubr.msk.f32.vlgmr.msra.gmra.mrb[6].mxu0 %vm28_vm2, %v761_v27 }
0x1110   :  { %v851_v40 = vpop.permute.xlu1 %850 }
0x11e2   :  { %v835_v29 = vpop.f32.mrb[6].mxu0 }
0x11e3   :  { %v839_v30 = vadd.f32 %v1063_v28, %v835_v29  ;;  %v1187_v31 = vpop.f32.mrb[7].mxu0 }
0x11e5   :  { %v1065_v32 = vmul.f32 -1.442695, %v839_v30 }
0x11e7   :  { %1303 = vpow2.f32 %v1065_v32 }
0x11e8   :  { %1305 = vtanh.f32 %v839_v30 }
0x11f1   :  { %v1304_v33 = vpop.eup %1303 }
0x11f2   :  { %v843_v34 = vadd.f32 1.0, %v1304_v33  ;;  %v1306_v35 = vpop.eup %1305 }
0x11f4   :  { %1307 = vrcp.f32 %v843_v34 }
0x11fe   :  { %v1308_v36 = vpop.eup %1307 }
0x11ff   :  { %v847_v37 = vsel %vm21_vm3, %v1308_v36, %v1306_v35 }
0x1200   :  { %855 = vrot.lane.b32.xlu0 %v847_v37, %s1370_s24  ;;  %v853_v41 = vmul.f32 %v851_v40, %v847_v37 }
0x1272   :  { %v856_v38 = vpop.permute.xlu0 %855 }
0x1273   :  { %v858_v39 = vmul.f32 %v856_v38, %v847_v37 }
0x1275   :  { %860 = vrot.lane.b32.xlu0 %v858_v39, %s1370_s24 }
0x12e7   :  { %v861_v42 = vpop.permute.xlu0 %860 }
0x12e8   :  { %v863_v43 = vadd.f32 %v861_v42, %v853_v41 }
0x12ea   :  { %1309 = vtanh.f32 %v863_v43 }
0x12f4   :  { %v1310_v44 = vpop.eup %1309 }
0x12f5   :  { %866 = vrot.lane.b32.xlu1 %v1310_v44, %s1370_s24 }
0x12f9   :  { %871 = vrot.lane.b32.xlu1 %v863_v43, %s1371_s25 }
0x1367   :  { %v867_v45 = vpop.permute.xlu1 %866 }
0x1368   :  { %v869_v46 = vmul.f32 %v867_v45, %v847_v37 }
0x136a   :  { %876 = vrot.lane.b32.xlu0 %v869_v46, %s1372_s26 }
0x136b   :  { %v872_v47 = vpop.permute.xlu1 %871 }
0x136c   :  { %874 = vst.msk [vmem:[#allocation3] sm:$0x3] %vm16_vm0, %v872_v47 }
0x1373   :  { %v971_v48 = vld [vmem:[#allocation3] sm:$0x3] }
0x1374   :  { %973 = vrot.lane.b32.xlu1 %v971_v48, %s1370_s24 }
0x13dc   :  { %v877_v49 = vpop.permute.xlu0 %876 }
0x13dd   :  { %879 = vst.msk [vmem:[#allocation2] sm:$0x3] %vm16_vm0, %v877_v49  ;;  %1066 = vst.msk [vmem:[%s1643_s2 + $0xc] sm:$0x3] %vm16_vm0, %v877_v49 }
0x13e4   :  { %v884_v50 = vld [vmem:[#allocation2] sm:$0x3] }
0x13e5   :  { %1197 = vmatmul.mubr.msk.f32.vlgmr.msra.gmra.mrb[6].mxu1 %vm28_vm2, %v884_v50 }
0x13e6   :  { %v974_v63 = vpop.permute.xlu1 %973 }
0x14b8   :  { %v958_v52 = vpop.f32.mrb[6].mxu1 }
0x14b9   :  { %v962_v53 = vadd.f32 %v1067_v51, %v958_v52  ;;  %v1198_v54 = vpop.f32.mrb[7].mxu1 }
0x14bb   :  { %v1069_v55 = vmul.f32 -1.442695, %v962_v53 }
0x14bd   :  { %1311 = vpow2.f32 %v1069_v55 }
0x14be   :  { %1313 = vtanh.f32 %v962_v53 }
0x14c7   :  { %v1312_v56 = vpop.eup %1311 }
0x14c8   :  { %v966_v57 = vadd.f32 1.0, %v1312_v56  ;;  %v1314_v58 = vpop.eup %1313 }
0x14ca   :  { %1315 = vrcp.f32 %v966_v57 }
0x14d4   :  { %v1316_v59 = vpop.eup %1315 }
0x14d5   :  { %v970_v60 = vsel %vm21_vm3, %v1316_v59, %v1314_v58 }
0x14d6   :  { %978 = vrot.lane.b32.xlu0 %v970_v60, %s1370_s24  ;;  %v976_v0 = vmul.f32 %v974_v63, %v970_v60 }
0x1548   :  { %v979_v61 = vpop.permute.xlu0 %978 }
0x1549   :  { %v981_v62 = vmul.f32 %v979_v61, %v970_v60 }
0x154b   :  { %983 = vrot.lane.b32.xlu0 %v981_v62, %s1370_s24 }
0x15bd   :  { %v984_v1 = vpop.permute.xlu0 %983 }
0x15be   :  { %v986_v2 = vadd.f32 %v984_v1, %v976_v0 }
0x15c0   :  { %1317 = vtanh.f32 %v986_v2  ;;  %994 = vrot.lane.b32.xlu0 %v986_v2, %s1371_s25 }
0x15ca   :  { %v1318_v5 = vpop.eup %1317 }
0x15cb   :  { %989 = vrot.lane.b32.xlu1 %v1318_v5, %s1370_s24 }
0x1632   :  { %v995_v8 = vpop.permute.xlu0 %994 }
0x1633   :  { %997 = vst.msk [vmem:[#allocation3] sm:$0x3] %vm16_vm0, %v995_v8 }
0x163a   :  { %v1007_v17 = vld [vmem:[#allocation3] sm:$0x3] }
0x163b   :  { %1008 = vst.msk [vmem:[#allocation6] sm:$0x3] %vm16_vm0, %v1007_v17 }
0x163c   :  { %1330 = shalt.err (!%p1327_p4)
}
0x163d   :  { %s1331_s24 = scalar_lea.hbm %s1645_s4, 32 }
0x163e   :  { %p1332_p5 = scmp.ne.s32.totalorder %s1645_s4, %s1331_s24  ;;  %p1335_p6 = scmp.lt.u32.totalorder %s1331_s24, %s1645_s4 }
0x1640   :  { %p1337_p7 = pnand %p1335_p6, %p1332_p5 }
0x1642   :  { %1340 = shalt.err (!%p1337_p7)
}
0x1643   :  { %1030 = dma.vmem_to_hbm [thread:$0]  %s1028_s5, 32, %s1645_s4, [#allocation7]   ;;  %v990_v9 = vpop.permute.xlu1 %989 }
0x1644   :  { %v992_v10 = vmul.f32 %v990_v9, %v970_v60  ;;  %s1374_s16 = smov [#allocation4]  }
0x1645   :  { %s1017_s17 = sshll.u32 %s1374_s16, 4  ;;  %s1018_s17 = int_to_ptr.vmem [resolvable:$true] %s1017_s17 }
0x1646   :  { %999 = vrot.lane.b32.xlu1 %v992_v10, %s1372_s26  ;;  %s1341_s18 = scalar_lea.vmem %s1018_s17, 32  ;;  %p1346_p9 = scmp.lt.s32.totalorder %s1018_s17, %s1018_s17 }
0x1647   :  { %p1342_p8 = scmp.ne.s32.totalorder %s1018_s17, %s1341_s18  ;;  %p1347_p10 = scmp.lt.s32.totalorder %s1341_s18, %s1341_s18 }
0x1649   :  { %p1348_p11 = por %p1347_p10, %p1346_p9 }
0x164b   :  { %p1349_p12 = pnand %p1348_p11, %p1342_p8 }
0x16b8   :  { %v1000_v11 = vpop.permute.xlu1 %999 }
0x16b9   :  { %1002 = vst.msk [vmem:[#allocation2] sm:$0x3] %vm16_vm0, %v1000_v11  ;;  %1070 = vst.msk [vmem:[%s1643_s2 + $0xe] sm:$0x3] %vm16_vm0, %v1000_v11 }
0x16c0   :  { %v1005_v12 = vld [vmem:[#allocation2] sm:$0x3] }
0x16c1   :  { %1006 = vst.msk [vmem:[#allocation4] sm:$0x3] %vm16_vm0, %v1005_v12 }
0x16c2   :  { %1352 = shalt.err (!%p1349_p12)
}
0x16c3   :  { %s1353_s19 = scalar_lea.hbm %s1644_s3, 32 }
0x16c4   :  { %p1354_p13 = scmp.ne.s32.totalorder %s1644_s3, %s1353_s19  ;;  %p1357_p0 = scmp.lt.u32.totalorder %s1353_s19, %s1644_s3 }
0x16c6   :  { %p1359_p1 = pnand %p1357_p0, %p1354_p13 }
0x16c8   :  { %1362 = shalt.err (!%p1359_p1)
}
0x16c9   :  { %1020 = dma.vmem_to_hbm [thread:$0]  %s1018_s17, 32, %s1644_s3, [#allocation5]  }
0x16ca   :  { %1363 = dma.done.wait [#allocation5], 32  }
0x16cb   :  { %1364 = vsyncadd [#allocation5], 4294967264 }
0x16cc   :  { %1365 = dma.done.wait [#allocation7], 32  }
0x16cd   :  { %1366 = vsyncadd [#allocation7], 4294967264 }
0x16ce   :  { %1039 = vsyncpa [#allocation5], 1 }
0x16cf   :  { %1040 = vsyncpa [#allocation7], 1 }

</bundles_post_ra>
